<compile_context>
chip_gen: v7x
topology: tpu7x:2x2x1
jax: 0.10.0
libtpu: 0.0.40
codegen_flags: <defaults>
</compile_context>

<pallas_src>
import functools

import jax
import jax.numpy as jnp
from jax import lax
from jax.experimental import pallas as pl
from jax.experimental.pallas import tpu as pltpu


# ----------------------------- Pallas kernels ------------------------------

def _conv_matmul_kernel(pm_ref, wc_ref, bc_ref, o_ref):
    # One row-tile of the (pixel-grouped) im2col conv:  o = relu(pm @ Wbd + bc)
    w = wc_ref[...]
    x = pm_ref[...].astype(w.dtype)            # optional bf16 cast for the MXU
    acc = jnp.dot(x, w, preferred_element_type=jnp.float32)
    o_ref[...] = jnp.maximum(acc + bc_ref[...], 0.0)


def _encoder_heads_kernel(x_ref, we_ref, be_ref, wh_ref, bh_ref, o_ref):
    # features = relu(x @ We + be) ; o = features @ Wh + bh
    # Wh/bh are the policy and value heads concatenated (and 128-lane padded).
    we = we_ref[...]
    f = jnp.dot(x_ref[...].astype(we.dtype), we, preferred_element_type=jnp.float32)
    f = jnp.maximum(f + be_ref[...], 0.0)
    wh = wh_ref[...]
    o_ref[...] = (jnp.dot(f.astype(wh.dtype), wh, preferred_element_type=jnp.float32)
                  + bh_ref[...])


# ------------------------------- params / prep -----------------------------

def _round_up(n, m):
    return ((n + m - 1) // m) * m


def init_params(key, C, H, W, conv_ch, feature_dim, num_actions):
    """Deterministic PyTorch-style uniform(-1/sqrt(fan_in), 1/sqrt(fan_in)) init."""
    ks = jax.random.split(key, 8)

    def unif(k, shape, fan_in):
        bound = 1.0 / float(fan_in) ** 0.5
        return jax.random.uniform(k, shape, jnp.float32, -bound, bound)

    D2 = conv_ch * H * W
    return dict(
        Wc=unif(ks[0], (conv_ch, C, 3, 3), C * 9),      # conv weight [O, I, kh, kw]
        bc=unif(ks[1], (conv_ch,), C * 9),
        We=unif(ks[2], (feature_dim, D2), D2),          # encoder Linear [out, in]
        be=unif(ks[3], (feature_dim,), D2),
        Wp=unif(ks[4], (num_actions, feature_dim), feature_dim),
        bp=unif(ks[5], (num_actions,), feature_dim),
        Wv=unif(ks[6], (1, feature_dim), feature_dim),
        bv=unif(ks[7], (1,), feature_dim),
    )


def preprocess_params(params, H, W, num_actions, matmul_dtype=jnp.float32):
    """One-time weight layout work (kept OUT of the per-call path):
       - conv weight -> im2col layout [C*9, conv_ch], tap order (c, kh, kw),
         then expanded block-diagonally to group GROUP=8 pixels per matmul row
         so the conv output is lane-dense (8*conv_ch lanes, unmasked vst)
       - encoder weight rows permuted from torch's NCHW flatten (c,h,w) order
         to the kernel's (h,w,c) order, so no activation transpose is needed
       - policy/value heads concatenated and zero-padded to a lane-dense 128
         wide output (unmasked vst)
       - matmul operands optionally stored as bf16 (v6e/v7x MXU); biases f32."""
    conv_ch, C = params["Wc"].shape[0], params["Wc"].shape[1]
    feature_dim = params["We"].shape[0]
    K = C * 9

    group = 8 if (H * W) % 8 == 0 else 1                                  # pixels per row
    Wc_t = params["Wc"].reshape(conv_ch, K).T                             # [C*9, O]
    Wc_bd = jnp.kron(jnp.eye(group, dtype=jnp.float32), Wc_t)             # [g*K, g*O]
    Wc_bd = Wc_bd.astype(matmul_dtype)
    bc = jnp.tile(params["bc"][None, :], (1, group)).astype(jnp.float32)  # [1, g*O]

    We_perm = (params["We"].reshape(feature_dim, conv_ch, H, W)
               .transpose(0, 2, 3, 1)                                     # [F,H,W,C]
               .reshape(feature_dim, H * W * conv_ch)
               .T.astype(matmul_dtype))                                   # [H*W*C, F]
    be = params["be"][None, :].astype(jnp.float32)

    Hd = num_actions + 1                                                  # logits ++ value
    Hp = _round_up(Hd, 128)
    Wh = jnp.concatenate([params["Wp"], params["Wv"]], axis=0).T          # [F, Hd]
    Wh = jnp.pad(Wh, ((0, 0), (0, Hp - Hd))).astype(matmul_dtype)         # [F, 128]
    bh = jnp.pad(jnp.concatenate([params["bp"], params["bv"]])[None, :],
                 ((0, 0), (0, Hp - Hd))).astype(jnp.float32)              # [1, 128]

    return dict(Wc_bd=Wc_bd, bc=bc, We=We_perm, be=be, Wh=Wh, bh=bh)


# --------------------------------- forward ----------------------------------

@functools.partial(jax.jit, static_argnames=("num_actions",))
def actor_critic_forward(x, prep, *, num_actions):
    """x: [B, C, H, W] float32 -> (action_logits [B, A], state_values [B, 1])."""
    B, C, H, W = x.shape
    K = C * 9
    GK = prep["Wc_bd"].shape[0]
    group = GK // K                                   # pixels grouped per matmul row
    GO = prep["Wc_bd"].shape[1]                       # group * conv_ch (lane-dense)
    conv_ch = GO // group
    feature_dim = prep["We"].shape[1]
    R = B * H * W
    Rg = R // group
    D2 = H * W * conv_ch
    Hp = prep["Wh"].shape[1]

    # im2col for the 3x3 / stride 1 / pad 1 conv.  Tiny here (R*K*4 = 72 KB)
    # and fused by XLA under jit.
    # TODO(synk): build the 9 taps in-kernel from an NHWC VMEM buffer once
    # B*H*W grows enough for the 9x patch expansion to dominate HBM traffic.
    xp = jnp.pad(x, ((0, 0), (0, 0), (1, 1), (1, 1)))
    taps = [xp[:, :, i:i + H, j:j + W] for i in range(3) for j in range(3)]
    patches = jnp.stack(taps, axis=2).transpose(0, 3, 4, 1, 2)    # [B,H,W,C,9]
    pm = patches.reshape(Rg, group * K)               # 8 pixels per row (contiguous)

    # ---- kernel 1: conv-as-matmul + bias + ReLU, tiled over pixel-group rows ----
    TR = min(Rg, 512)
    conv_out = pl.pallas_call(
        _conv_matmul_kernel,
        out_shape=jax.ShapeDtypeStruct((Rg, GO), jnp.float32),
        grid=(pl.cdiv(Rg, TR),),
        in_specs=[
            pl.BlockSpec((TR, GK), lambda i: (i, 0)),
            pl.BlockSpec((GK, GO), lambda i: (0, 0)),
            pl.BlockSpec((1, GO), lambda i: (0, 0)),
        ],
        out_specs=pl.BlockSpec((TR, GO), lambda i: (i, 0)),
        compiler_params=pltpu.CompilerParams(
            dimension_semantics=("parallel",)),
        cost_estimate=pl.CostEstimate(
            flops=2 * Rg * GK * GO,
            transcendentals=0,
            bytes_accessed=4 * (Rg * GK + GK * GO + Rg * GO)),
    )(pm, prep["Wc_bd"], prep["bc"])

    # Contiguous flatten: memory order of conv_out is (b, h, w, c) — the block
    # diagonal grouping keeps the (pixel, channel) order — and the (h,w,c)
    # permutation was folded into We at preprocessing time, so this reshape is
    # pure metadata (no transpose, no extra HBM pass).
    feat_in = conv_out.reshape(B, D2)

    # ---- kernel 2: encoder Linear + ReLU fused with both heads (lane-dense out) ----
    TB = min(B, 256)
    out = pl.pallas_call(
        _encoder_heads_kernel,
        out_shape=jax.ShapeDtypeStruct((B, Hp), jnp.float32),
        grid=(pl.cdiv(B, TB),),
        in_specs=[
            pl.BlockSpec((TB, D2), lambda i: (i, 0)),
            pl.BlockSpec((D2, feature_dim), lambda i: (0, 0)),
            pl.BlockSpec((1, feature_dim), lambda i: (0, 0)),
            pl.BlockSpec((feature_dim, Hp), lambda i: (0, 0)),
            pl.BlockSpec((1, Hp), lambda i: (0, 0)),
        ],
        out_specs=pl.BlockSpec((TB, Hp), lambda i: (i, 0)),
        compiler_params=pltpu.CompilerParams(
            dimension_semantics=("parallel",)),
        cost_estimate=pl.CostEstimate(
            flops=2 * B * (D2 * feature_dim + feature_dim * Hp),
            transcendentals=0,
            bytes_accessed=4 * (B * D2 + D2 * feature_dim
                                + feature_dim * Hp + B * Hp)),
    )(feat_in, prep["We"], prep["be"], prep["Wh"], prep["bh"])

    action_logits = out[:, :num_actions]
    state_values = out[:, num_actions:num_actions + 1]
    return action_logits, state_values


# ------------------------------ pure-JAX reference --------------------------

def reference_forward(x, params, num_actions):
    y = lax.conv_general_dilated(x, params["Wc"], (1, 1), "SAME",
                                 dimension_numbers=("NCHW", "OIHW", "NCHW"))
    y = jnp.maximum(y + params["bc"][None, :, None, None], 0.0)
    f = y.reshape(x.shape[0], -1)
    f = jnp.maximum(f @ params["We"].T + params["be"], 0.0)
    logits = f @ params["Wp"].T + params["bp"]
    values = f @ params["Wv"].T + params["bv"]
    return logits, values


# ----------------------------------- main -----------------------------------

if __name__ == "__main__":
    B, C, H, W = 2, 4, 16, 16
    CONV_CH, FEATURE_DIM, NUM_ACTIONS = 16, 32, 6

    key = jax.random.PRNGKey(0)
    k_x, k_p = jax.random.split(key)
    x = jax.random.normal(k_x, (B, C, H, W), jnp.float32)
    params = init_params(k_p, C, H, W, CONV_CH, FEATURE_DIM, NUM_ACTIONS)

    ref_logits, ref_values = reference_forward(x, params, NUM_ACTIONS)

    # f32 matmul path (exact check against the f32 reference).
    prep_f32 = preprocess_params(params, H, W, NUM_ACTIONS, matmul_dtype=jnp.float32)
    logits, values = actor_critic_forward(x, prep_f32, num_actions=NUM_ACTIONS)
    jax.block_until_ready((logits, values))
    assert logits.shape == (B, NUM_ACTIONS) and values.shape == (B, 1)
    assert jnp.allclose(logits, ref_logits, rtol=2e-3, atol=2e-3)
    assert jnp.allclose(values, ref_values, rtol=2e-3, atol=2e-3)

    # bf16 matmul operands (f32 accumulation) — preferred on v6e/v7x MXUs.
    prep_bf16 = preprocess_params(params, H, W, NUM_ACTIONS, matmul_dtype=jnp.bfloat16)
    logits_bf, values_bf = actor_critic_forward(x, prep_bf16, num_actions=NUM_ACTIONS)
    jax.block_until_ready((logits_bf, values_bf))
    assert jnp.allclose(logits_bf, ref_logits, rtol=5e-2, atol=5e-2)
    assert jnp.allclose(values_bf, ref_values, rtol=5e-2, atol=5e-2)

    print("KERNEL_OK")
</pallas_src>

<mosaic_0001>
module attributes {stable_mosaic.version = 11 : i64} {
  func.func @_conv_matmul_kernel(%arg0: i32, %arg1: memref<64x288xf32, #tpu.memory_space<vmem>>, %arg2: memref<288x128xf32, #tpu.memory_space<vmem>>, %arg3: memref<1x128xf32, #tpu.memory_space<vmem>>, %arg4: memref<64x128xf32, #tpu.memory_space<vmem>>) attributes {dimension_semantics = [#tpu.dimension_semantics<parallel>], iteration_bounds = array<i64: 1>, scalar_prefetch = 0 : i64, scratch_operands = 0 : i64, tpu.core_type = #tpu.core_type<tc>, window_params = [{transform_indices = @transform_0, window_bounds = array<i64: 64, 288>}, {pipeline_mode = #tpu.pipeline_mode<synchronous>, transform_indices = @transform_1, window_bounds = array<i64: 288, 128>}, {pipeline_mode = #tpu.pipeline_mode<synchronous>, transform_indices = @transform_2, window_bounds = array<i64: 1, 128>}, {transform_indices = @transform_3, window_bounds = array<i64: 64, 128>}]} {
    %c0 = arith.constant 0 : index
    %c0_0 = arith.constant 0 : index
    %0 = vector.load %arg2[%c0, %c0_0] : memref<288x128xf32, #tpu.memory_space<vmem>>, vector<288x128xf32>
    %c0_1 = arith.constant 0 : index
    %c0_2 = arith.constant 0 : index
    %1 = vector.load %arg1[%c0_1, %c0_2] : memref<64x288xf32, #tpu.memory_space<vmem>>, vector<64x288xf32>
    %cst = arith.constant dense<0.000000e+00> : vector<64x128xf32>
    %2 = tpu.matmul %1, %0, %cst {dimension_numbers = #tpu.dot_dimension_numbers<[1], [0], [0], [1], [0, 0, 1, 1], [], []>} : vector<64x288xf32>, vector<288x128xf32>, vector<64x128xf32> -> vector<64x128xf32>
    %c0_3 = arith.constant 0 : index
    %c0_4 = arith.constant 0 : index
    %3 = vector.load %arg3[%c0_3, %c0_4] : memref<1x128xf32, #tpu.memory_space<vmem>>, vector<1x128xf32>
    %4 = vector.broadcast %3 : vector<1x128xf32> to vector<64x128xf32>
    %5 = arith.addf %2, %4 : vector<64x128xf32>
    %cst_5 = arith.constant 0.000000e+00 : f32
    %6 = vector.broadcast %cst_5 : f32 to vector<64x128xf32>
    %7 = arith.maximumf %5, %6 : vector<64x128xf32>
    %c0_6 = arith.constant 0 : index
    %c0_7 = arith.constant 0 : index
    %8 = vector.load %arg4[%c0_6, %c0_7] : memref<64x128xf32, #tpu.memory_space<vmem>>, vector<64x128xf32>
    tpu.vector_store %arg4[%c0_6, %c0_7], %7 {strides = array<i32>} : memref<64x128xf32, #tpu.memory_space<vmem>>, vector<64x128xf32>,
    return
  }
  func.func @transform_0(%arg0: i32) -> (i32, i32) {
    %c0_i32 = arith.constant 0 : i32
    %c0_i32_0 = arith.constant 0 : i32
    return %arg0, %c0_i32 : i32, i32
  }
  func.func @transform_1(%arg0: i32) -> (i32, i32) {
    %c0_i32 = arith.constant 0 : i32
    %c0_i32_0 = arith.constant 0 : i32
    %c0_i32_1 = arith.constant 0 : i32
    return %c0_i32, %c0_i32_0 : i32, i32
  }
  func.func @transform_2(%arg0: i32) -> (i32, i32) {
    %c0_i32 = arith.constant 0 : i32
    %c0_i32_0 = arith.constant 0 : i32
    %c0_i32_1 = arith.constant 0 : i32
    return %c0_i32, %c0_i32_0 : i32, i32
  }
  func.func @transform_3(%arg0: i32) -> (i32, i32) {
    %c0_i32 = arith.constant 0 : i32
    %c0_i32_0 = arith.constant 0 : i32
    return %arg0, %c0_i32 : i32, i32
  }
}

module attributes {stable_mosaic.version = 11 : i64} {
  func.func @_encoder_heads_kernel(%arg0: i32, %arg1: memref<2x4096xf32, #tpu.memory_space<vmem>>, %arg2: memref<4096x32xf32, #tpu.memory_space<vmem>>, %arg3: memref<1x32xf32, #tpu.memory_space<vmem>>, %arg4: memref<32x128xf32, #tpu.memory_space<vmem>>, %arg5: memref<1x128xf32, #tpu.memory_space<vmem>>, %arg6: memref<2x128xf32, #tpu.memory_space<vmem>>) attributes {dimension_semantics = [#tpu.dimension_semantics<parallel>], iteration_bounds = array<i64: 1>, scalar_prefetch = 0 : i64, scratch_operands = 0 : i64, tpu.core_type = #tpu.core_type<tc>, window_params = [{transform_indices = @transform_0, window_bounds = array<i64: 2, 4096>}, {pipeline_mode = #tpu.pipeline_mode<synchronous>, transform_indices = @transform_1, window_bounds = array<i64: 4096, 32>}, {pipeline_mode = #tpu.pipeline_mode<synchronous>, transform_indices = @transform_2, window_bounds = array<i64: 1, 32>}, {pipeline_mode = #tpu.pipeline_mode<synchronous>, transform_indices = @transform_3, window_bounds = array<i64: 32, 128>}, {pipeline_mode = #tpu.pipeline_mode<synchronous>, transform_indices = @transform_4, window_bounds = array<i64: 1, 128>}, {transform_indices = @transform_5, window_bounds = array<i64: 2, 128>}]} {
    %c0 = arith.constant 0 : index
    %c0_0 = arith.constant 0 : index
    %0 = vector.load %arg2[%c0, %c0_0] : memref<4096x32xf32, #tpu.memory_space<vmem>>, vector<4096x32xf32>
    %c0_1 = arith.constant 0 : index
    %c0_2 = arith.constant 0 : index
    %1 = vector.load %arg1[%c0_1, %c0_2] : memref<2x4096xf32, #tpu.memory_space<vmem>>, vector<2x4096xf32>
    %cst = arith.constant dense<0.000000e+00> : vector<2x32xf32>
    %2 = tpu.matmul %1, %0, %cst {dimension_numbers = #tpu.dot_dimension_numbers<[1], [0], [0], [1], [0, 0, 1, 1], [], []>} : vector<2x4096xf32>, vector<4096x32xf32>, vector<2x32xf32> -> vector<2x32xf32>
    %c0_3 = arith.constant 0 : index
    %c0_4 = arith.constant 0 : index
    %3 = vector.load %arg3[%c0_3, %c0_4] : memref<1x32xf32, #tpu.memory_space<vmem>>, vector<1x32xf32>
    %4 = vector.broadcast %3 : vector<1x32xf32> to vector<2x32xf32>
    %5 = arith.addf %2, %4 : vector<2x32xf32>
    %cst_5 = arith.constant 0.000000e+00 : f32
    %6 = vector.broadcast %cst_5 : f32 to vector<2x32xf32>
    %7 = arith.maximumf %5, %6 : vector<2x32xf32>
    %c0_6 = arith.constant 0 : index
    %c0_7 = arith.constant 0 : index
    %8 = vector.load %arg4[%c0_6, %c0_7] : memref<32x128xf32, #tpu.memory_space<vmem>>, vector<32x128xf32>
    %cst_8 = arith.constant dense<0.000000e+00> : vector<2x128xf32>
    %9 = tpu.matmul %7, %8, %cst_8 {dimension_numbers = #tpu.dot_dimension_numbers<[1], [0], [0], [1], [0, 0, 1, 1], [], []>} : vector<2x32xf32>, vector<32x128xf32>, vector<2x128xf32> -> vector<2x128xf32>
    %c0_9 = arith.constant 0 : index
    %c0_10 = arith.constant 0 : index
    %10 = vector.load %arg5[%c0_9, %c0_10] : memref<1x128xf32, #tpu.memory_space<vmem>>, vector<1x128xf32>
    %11 = vector.broadcast %10 : vector<1x128xf32> to vector<2x128xf32>
    %12 = arith.addf %9, %11 : vector<2x128xf32>
    %c0_11 = arith.constant 0 : index
    %c0_12 = arith.constant 0 : index
    %13 = vector.load %arg6[%c0_11, %c0_12] : memref<2x128xf32, #tpu.memory_space<vmem>>, vector<2x128xf32>
    tpu.vector_store %arg6[%c0_11, %c0_12], %12 {strides = array<i32>} : memref<2x128xf32, #tpu.memory_space<vmem>>, vector<2x128xf32>,
    return
  }
  func.func @transform_0(%arg0: i32) -> (i32, i32) {
    %c0_i32 = arith.constant 0 : i32
    %c0_i32_0 = arith.constant 0 : i32
    return %arg0, %c0_i32 : i32, i32
  }
  func.func @transform_1(%arg0: i32) -> (i32, i32) {
    %c0_i32 = arith.constant 0 : i32
    %c0_i32_0 = arith.constant 0 : i32
    %c0_i32_1 = arith.constant 0 : i32
    return %c0_i32, %c0_i32_0 : i32, i32
  }
  func.func @transform_2(%arg0: i32) -> (i32, i32) {
    %c0_i32 = arith.constant 0 : i32
    %c0_i32_0 = arith.constant 0 : i32
    %c0_i32_1 = arith.constant 0 : i32
    return %c0_i32, %c0_i32_0 : i32, i32
  }
  func.func @transform_3(%arg0: i32) -> (i32, i32) {
    %c0_i32 = arith.constant 0 : i32
    %c0_i32_0 = arith.constant 0 : i32
    %c0_i32_1 = arith.constant 0 : i32
    return %c0_i32, %c0_i32_0 : i32, i32
  }
  func.func @transform_4(%arg0: i32) -> (i32, i32) {
    %c0_i32 = arith.constant 0 : i32
    %c0_i32_0 = arith.constant 0 : i32
    %c0_i32_1 = arith.constant 0 : i32
    return %c0_i32, %c0_i32_0 : i32, i32
  }
  func.func @transform_5(%arg0: i32) -> (i32, i32) {
    %c0_i32 = arith.constant 0 : i32
    %c0_i32_0 = arith.constant 0 : i32
    return %arg0, %c0_i32 : i32, i32
  }
}

</mosaic_0001>

<bundles_post_ra>
// kernel: actor_critic_forward.2
= control target key start
LH: loop header
LB: loop body
LE: loop exit
PB: predicated region body
PF: predicated region fallthrough
CT: control target
= control target key end

     0   :  { %vm81_vm0 = vcmask 261120   ;;  %s724_s1 = inlined_call_operand.vmem [shape: f32[288,128], index: 1, kind: input, shape index: {}]   ;;  %s725_s0 = inlined_call_operand.vmem [shape: f32[64,288], index: 0, kind: input, shape index: {}]   ;;  %s726_s2 = inlined_call_operand.vmem [shape: f32[1,128], index: 2, kind: input, shape index: {}]   ;;  %s727_s3 = inlined_call_operand.vmem [shape: f32[64,128], index: 3, kind: output, shape index: {}]  }
   0x1   :  { %v30_v0 = vld [vmem:[%s724_s1 + $0x80] sm:$0xff]  ;;  %v31_v1 = vld [vmem:[%s724_s1 + $0x88] sm:$0xff]  ;;  %v32_v5 = vld [vmem:[%s724_s1 + $0x90] sm:$0xff] }
   0x2   :  { %v14_v2 = vld [vmem:[%s724_s1] sm:$0xff]  ;;  %v433_v3 = vpack.c.bf16 %v31_v1, %v30_v0  ;;  %v15_v4 = vld [vmem:[%s724_s1 + $0x8] sm:$0xff]  ;;  %v33_v6 = vld [vmem:[%s724_s1 + $0x98] sm:$0xff] }
   0x3   :  { %v435_v7 = vpack.c.bf16 %v15_v4, %v14_v2  ;;  %v437_v8 = vpack.c.bf16 %v33_v6, %v32_v5  ;;  %v16_v9 = vld [vmem:[%s724_s1 + $0x10] sm:$0xff]  ;;  %v17_v10 = vld [vmem:[%s724_s1 + $0x18] sm:$0xff]  ;;  %v34_v11 = vld [vmem:[%s724_s1 + $0xa0] sm:$0xff] }
   0x4   :  { %434 = vmatprep.subr.bf16.mxu0 %v433_v3  ;;  %473 = vmatprep.subr.bf16.mxu1 %v433_v3  ;;  %v35_v12 = vld [vmem:[%s724_s1 + $0xa8] sm:$0xff]  ;;  %v439_v13 = vpack.c.bf16 %v17_v10, %v16_v9  ;;  %v18_v15 = vld [vmem:[%s724_s1 + $0x20] sm:$0xff]  ;;  %v36_v17 = vld [vmem:[%s724_s1 + $0xb0] sm:$0xff] }
   0x5   :  { %436 = vmatpush3.bf16.msra.mxu0 %v435_v7  ;;  %481 = vmatpush3.bf16.msra.mxu1 %v435_v7  ;;  %v441_v14 = vpack.c.bf16 %v35_v12, %v34_v11  ;;  %v19_v16 = vld [vmem:[%s724_s1 + $0x28] sm:$0xff]  ;;  %v37_v18 = vld [vmem:[%s724_s1 + $0xb8] sm:$0xff]  ;;  %v20_v21 = vld [vmem:[%s724_s1 + $0x30] sm:$0xff] }
   0x6   :  { %438 = vmatprep.subr.bf16.mxu0 %v437_v8  ;;  %474 = vmatprep.subr.bf16.mxu1 %v437_v8  ;;  %v443_v19 = vpack.c.bf16 %v19_v16, %v18_v15  ;;  %v445_v20 = vpack.c.bf16 %v37_v18, %v36_v17  ;;  %v21_v22 = vld [vmem:[%s724_s1 + $0x38] sm:$0xff]  ;;  %v38_v23 = vld [vmem:[%s724_s1 + $0xc0] sm:$0xff]  ;;  %v39_v24 = vld [vmem:[%s724_s1 + $0xc8] sm:$0xff] }
   0x7   :  { %v51_v25 = vld [vmem:[%s725_s0 + $0x8] sm:$0xff]  ;;  %v69_v26 = vld [vmem:[%s725_s0 + $0x98] sm:$0xff]  ;;  %v447_v27 = vpack.c.bf16 %v21_v22, %v20_v21  ;;  %v449_v28 = vpack.c.bf16 %v39_v24, %v38_v23  ;;  %v22_v29 = vld [vmem:[%s724_s1 + $0x40] sm:$0xff] }
   0x8   :  { %170 = vmatprep.mubr.f32.mxu0 %v51_v25  ;;  %v23_v30 = vld [vmem:[%s724_s1 + $0x48] sm:$0xff]  ;;  %v40_v31 = vld [vmem:[%s724_s1 + $0xd0] sm:$0xff]  ;;  %v41_v32 = vld [vmem:[%s724_s1 + $0xd8] sm:$0xff]  ;;  %200 = vmatprep.mubr.f32.mxu1 %v69_v26 }
   0x9   :  { %440 = vmatpush3.bf16.msra.mxu0 %v439_v13  ;;  %482 = vmatpush3.bf16.msra.mxu1 %v439_v13  ;;  %v451_v33 = vpack.c.bf16 %v23_v30, %v22_v29  ;;  %v453_v34 = vpack.c.bf16 %v41_v32, %v40_v31  ;;  %v24_v35 = vld [vmem:[%s724_s1 + $0x50] sm:$0xff]  ;;  %v25_v36 = vld [vmem:[%s724_s1 + $0x58] sm:$0xff]  ;;  %v42_v37 = vld [vmem:[%s724_s1 + $0xe0] sm:$0xff] }
   0xa   :  { %442 = vmatprep.subr.bf16.mxu0 %v441_v14  ;;  %475 = vmatprep.subr.bf16.mxu1 %v441_v14  ;;  %v43_v38 = vld [vmem:[%s724_s1 + $0xe8] sm:$0xff]  ;;  %v455_v39 = vpack.c.bf16 %v25_v36, %v24_v35  ;;  %v26_v41 = vld [vmem:[%s724_s1 + $0x60] sm:$0xff]  ;;  %v44_v43 = vld [vmem:[%s724_s1 + $0xf0] sm:$0xff] }
   0xb   :  { %v457_v40 = vpack.c.bf16 %v43_v38, %v42_v37  ;;  %v27_v42 = vld [vmem:[%s724_s1 + $0x68] sm:$0xff]  ;;  %v45_v44 = vld [vmem:[%s724_s1 + $0xf8] sm:$0xff]  ;;  %v28_v47 = vld [vmem:[%s724_s1 + $0x70] sm:$0xff] }
   0xc   :  { %v459_v45 = vpack.c.bf16 %v27_v42, %v26_v41  ;;  %v461_v46 = vpack.c.bf16 %v45_v44, %v44_v43  ;;  %v29_v48 = vld [vmem:[%s724_s1 + $0x78] sm:$0xff]  ;;  %v46_v49 = vld [vmem:[%s724_s1 + $0x100] sm:$0xff]  ;;  %v47_v50 = vld [vmem:[%s724_s1 + $0x108] sm:$0xff] }
   0xd   :  { %444 = vmatpush3.bf16.msra.mxu0 %v443_v19  ;;  %483 = vmatpush3.bf16.msra.mxu1 %v443_v19  ;;  %v463_v51 = vpack.c.bf16 %v29_v48, %v28_v47  ;;  %v465_v52 = vpack.c.bf16 %v47_v50, %v46_v49  ;;  %v48_v53 = vld [vmem:[%s724_s1 + $0x110] sm:$0xff]  ;;  %v49_v54 = vld [vmem:[%s724_s1 + $0x118] sm:$0xff]  ;;  %v50_v55 = vld [vmem:[%s725_s0] sm:$0xff] }
   0xe   :  { %446 = vmatprep.subr.bf16.mxu0 %v445_v20  ;;  %476 = vmatprep.subr.bf16.mxu1 %v445_v20  ;;  %v68_v56 = vld [vmem:[%s725_s0 + $0x90] sm:$0xff]  ;;  %v54_v57 = vld [vmem:[%s725_s0 + $0x20] sm:$0xff]  ;;  %v469_v58 = vpack.c.bf16 %v49_v54, %v48_v53  ;;  %v53_v60 = vld [vmem:[%s725_s0 + $0x18] sm:$0xff] }
   0xf   :  { %v72_v59 = vld [vmem:[%s725_s0 + $0xb0] sm:$0xff]  ;;  %v71_v61 = vld [vmem:[%s725_s0 + $0xa8] sm:$0xff]  ;;  %v57_v62 = vld [vmem:[%s725_s0 + $0x38] sm:$0xff] }
  0x10   :  { %v52_v63 = vld [vmem:[%s725_s0 + $0x10] sm:$0xff]  ;;  %v55_v1 = vld [vmem:[%s725_s0 + $0x28] sm:$0xff]  ;;  %v58_v3 = vld [vmem:[%s725_s0 + $0x40] sm:$0xff] }
  0x11   :  { %448 = vmatpush3.bf16.msra.mxu0 %v447_v27  ;;  %484 = vmatpush3.bf16.msra.mxu1 %v447_v27  ;;  %v56_v0 = vld [vmem:[%s725_s0 + $0x30] sm:$0xff]  ;;  %v59_v4 = vld [vmem:[%s725_s0 + $0x48] sm:$0xff]  ;;  %v61_v5 = vld [vmem:[%s725_s0 + $0x58] sm:$0xff] }
  0x12   :  { %450 = vmatprep.subr.bf16.mxu0 %v449_v28  ;;  %477 = vmatprep.subr.bf16.mxu1 %v449_v28  ;;  %v60_v2 = vld [vmem:[%s725_s0 + $0x50] sm:$0xff]  ;;  %v63_v6 = vld [vmem:[%s725_s0 + $0x68] sm:$0xff]  ;;  %v62_v8 = vld [vmem:[%s725_s0 + $0x60] sm:$0xff] }
  0x13   :  { %v64_v7 = vld [vmem:[%s725_s0 + $0x70] sm:$0xff]  ;;  %v67_v9 = vld [vmem:[%s725_s0 + $0x88] sm:$0xff]  ;;  %v66_v10 = vld [vmem:[%s725_s0 + $0x80] sm:$0xff] }
  0x14   :  { %v70_v11 = vld [vmem:[%s725_s0 + $0xa0] sm:$0xff]  ;;  %v65_v12 = vld [vmem:[%s725_s0 + $0x78] sm:$0xff] }
  0x15   :  { %452 = vmatpush3.bf16.msra.mxu0 %v451_v33  ;;  %485 = vmatpush3.bf16.msra.mxu1 %v451_v33  ;;  %v73_v13 = vld [vmem:[%s725_s0 + $0xb8] sm:$0xff]  ;;  %v336_v24 = vld [vmem:[%s726_s2] ss:$0 sm:$0xff] }
  0x16   :  { %454 = vmatprep.subr.bf16.mxu0 %v453_v34  ;;  %478 = vmatprep.subr.bf16.mxu1 %v453_v34 }
  0x19   :  { %456 = vmatpush3.bf16.msra.mxu0 %v455_v39  ;;  %486 = vmatpush3.bf16.msra.mxu1 %v455_v39 }
  0x1a   :  { %458 = vmatprep.subr.bf16.mxu0 %v457_v40  ;;  %479 = vmatprep.subr.bf16.mxu1 %v457_v40 }
  0x1d   :  { %460 = vmatpush3.bf16.msra.mxu0 %v459_v45  ;;  %487 = vmatpush3.bf16.msra.mxu1 %v459_v45 }
  0x1e   :  { %462 = vmatprep.subr.bf16.mxu0 %v461_v46  ;;  %480 = vmatprep.subr.bf16.mxu1 %v461_v46 }
  0x21   :  { %464 = vmatpush3.bf16.msra.mxu0 %v463_v51  ;;  %488 = vmatpush3.bf16.msra.mxu1 %v463_v51 }
  0x22   :  { %466 = vmatprep.subr.bf16.mxu1 %v465_v52 }
  0x24   :  { %171 = vmatmul.mubr.f32.vlgmr.msra.gmra.mrb[0].mxu0 %v50_v55  ;;  %201 = vmatmul.mubr.f32.vlgmr.msra.gmra.mrb[0].mxu1 %v68_v56 }
  0x25   :  { %468 = vmatpush3.bf16.msra.mxu1 %v465_v52  ;;  %175 = vmatprep.mubr.f32.mxu0 %v54_v57 }
  0x26   :  { %205 = vmatprep.mubr.f32.mxu1 %v72_v59  ;;  %470 = vmatprep.subr.bf16.mxu1 %v469_v58 }
  0x28   :  { %176 = vmatmul.mubr.f32.gmra.mrb[2].mxu0 %v53_v60  ;;  %206 = vmatmul.mubr.f32.gmra.mrb[2].mxu1 %v71_v61 }
  0x29   :  { %472 = vmatpush3.bf16.msra.mxu1 %v469_v58  ;;  %180 = vmatprep.mubr.f32.mxu0 %v57_v62 }
  0x2a   :  { %421 = vmatprep.mubr.msk.f32.mxu1 %vm81_vm0, %v52_v63 }
  0x2c   :  { %181 = vmatmul.mubr.f32.gmra.mrb[4].mxu0 %v56_v0  ;;  %422 = vmatmul.mubr.msk.f32.vlgmr.msra.gmra.mrb[4].mxu1 %vm81_vm0, %v55_v1 }
  0x2d   :  { %185 = vmatprep.mubr.f32.mxu0 %v60_v2  ;;  %424 = vmatprep.mubr.msk.f32.mxu1 %vm81_vm0, %v58_v3 }
  0x30   :  { %186 = vmatmul.mubr.f32.gmra.mrb[6].mxu0 %v59_v4  ;;  %425 = vmatmul.mubr.msk.f32.gmra.mrb[6].mxu1 %vm81_vm0, %v61_v5 }
  0x31   :  { %190 = vmatprep.mubr.f32.mxu0 %v63_v6  ;;  %427 = vmatprep.mubr.msk.f32.mxu1 %vm81_vm0, %v64_v7 }
  0x34   :  { %191 = vmatmul.mubr.f32.gmra.mrb[8].mxu0 %v62_v8  ;;  %428 = vmatmul.mubr.msk.f32.gmra.mrb[8].mxu1 %vm81_vm0, %v67_v9 }
  0x35   :  { %195 = vmatprep.mubr.f32.mxu0 %v66_v10  ;;  %430 = vmatprep.mubr.msk.f32.mxu1 %vm81_vm0, %v70_v11 }
  0x38   :  { %196 = vmatmul.mubr.f32.gmra.mrb[10].mxu0 %v65_v12  ;;  %431 = vmatmul.mubr.msk.f32.gmra.mrb[10].mxu1 %vm81_vm0, %v73_v13 }
  0xf7   :  { %v377_v14 = vpop.f32.mrb[0].mxu0  ;;  %v395_v15 = vpop.f32.mrb[0].mxu1 }
  0xf8   :  { %v378_v16 = vpop.f32.mrb[1].mxu0  ;;  %v396_v17 = vpop.f32.mrb[1].mxu1 }
  0xf9   :  { %v379_v18 = vadd.f32 %v378_v16, %v377_v14  ;;  %v397_v19 = vadd.f32 %v396_v17, %v395_v15 }
  0xfb   :  { %v380_v20 = vpop.f32.mrb[2].mxu0  ;;  %v398_v21 = vpop.f32.mrb[2].mxu1  ;;  %v173_v30 = vadd.f32 %v379_v18, %v336_v24  ;;  %v203_v58 = vadd.f32 %v397_v19, %v336_v24 }
  0xfc   :  { %v381_v22 = vpop.f32.mrb[3].mxu0  ;;  %v399_v23 = vpop.f32.mrb[3].mxu1 }
  0xfd   :  { %v382_v25 = vadd.f32 %v381_v22, %v380_v20  ;;  %v400_v26 = vadd.f32 %v399_v23, %v398_v21 }
  0xff   :  { %v383_v27 = vpop.f32.mrb[4].mxu0  ;;  %v178_v28 = vadd.f32 %v382_v25, %v336_v24  ;;  %v423_v29 = vpop.f32.mrb[4].mxu1  ;;  %v208_v53 = vadd.f32 %v400_v26, %v336_v24 }
 0x100   :  { %v384_v31 = vpop.f32.mrb[5].mxu0  ;;  %v277_v32 = vpop.f32.mrb[5].mxu1 }
 0x101   :  { %v283_v33 = vadd.f32 %v423_v29, %v178_v28  ;;  %v385_v34 = vadd.f32 %v384_v31, %v383_v27  ;;  %v278_v35 = vadd.f32 %v277_v32, %v173_v30 }
 0x103   :  { %v317_v36 = vmax.f32 %v283_v33, 0.0  ;;  %v316_v37 = vmax.f32 %v278_v35, 0.0  ;;  %v386_v38 = vpop.f32.mrb[6].mxu0  ;;  %v426_v39 = vpop.f32.mrb[6].mxu1  ;;  %v183_v40 = vadd.f32 %v385_v34, %v336_v24 }
 0x104   :  { %v387_v41 = vpop.f32.mrb[7].mxu0  ;;  %v287_v42 = vpop.f32.mrb[7].mxu1 }
 0x105   :  { %325 = vst [vmem:[%s727_s3 + $0x8] sm:$0xff] %v317_v36  ;;  %324 = vst [vmem:[%s727_s3] sm:$0xff] %v316_v37  ;;  %v388_v43 = vadd.f32 %v387_v41, %v386_v38  ;;  %v288_v44 = vadd.f32 %v287_v42, %v183_v40 }
 0x107   :  { %v188_v45 = vadd.f32 %v388_v43, %v336_v24  ;;  %v318_v46 = vmax.f32 %v288_v44, 0.0  ;;  %v389_v47 = vpop.f32.mrb[8].mxu0  ;;  %v429_v48 = vpop.f32.mrb[8].mxu1 }
 0x108   :  { %v390_v49 = vpop.f32.mrb[9].mxu0  ;;  %v297_v50 = vpop.f32.mrb[9].mxu1 }
 0x109   :  { %v293_v51 = vadd.f32 %v426_v39, %v188_v45  ;;  %326 = vst [vmem:[%s727_s3 + $0x10] sm:$0xff] %v318_v46  ;;  %v391_v52 = vadd.f32 %v390_v49, %v389_v47 }
 0x10b   :  { %v319_v54 = vmax.f32 %v293_v51, 0.0  ;;  %v193_v55 = vadd.f32 %v391_v52, %v336_v24  ;;  %v392_v56 = vpop.f32.mrb[10].mxu0  ;;  %v432_v57 = vpop.f32.mrb[10].mxu1 }
 0x10c   :  { %v313_v59 = vadd.f32 %v432_v57, %v208_v53  ;;  %v393_v60 = vpop.f32.mrb[11].mxu0  ;;  %v307_v61 = vpop.f32.mrb[11].mxu1 }
 0x10d   :  { %327 = vst [vmem:[%s727_s3 + $0x18] sm:$0xff] %v319_v54  ;;  %v298_v62 = vadd.f32 %v297_v50, %v193_v55  ;;  %v394_v63 = vadd.f32 %v393_v60, %v392_v56  ;;  %v308_v0 = vadd.f32 %v307_v61, %v203_v58 }
 0x10e   :  { %v323_v1 = vmax.f32 %v313_v59, 0.0 }
 0x10f   :  { %v320_v2 = vmax.f32 %v298_v62, 0.0  ;;  %v198_v3 = vadd.f32 %v394_v63, %v336_v24  ;;  %v322_v4 = vmax.f32 %v308_v0, 0.0 }
 0x110   :  { %331 = vst [vmem:[%s727_s3 + $0x38] sm:$0xff] %v323_v1 }
 0x111   :  { %328 = vst [vmem:[%s727_s3 + $0x20] sm:$0xff] %v320_v2  ;;  %v303_v5 = vadd.f32 %v429_v48, %v198_v3  ;;  %330 = vst [vmem:[%s727_s3 + $0x30] sm:$0xff] %v322_v4 }
 0x113   :  { %v321_v6 = vmax.f32 %v303_v5, 0.0 }
 0x115   :  { %329 = vst [vmem:[%s727_s3 + $0x28] sm:$0xff] %v321_v6 }

// kernel: actor_critic_forward.3
= control target key start
LH: loop header
LB: loop body
LE: loop exit
PB: predicated region body
PF: predicated region fallthrough
CT: control target
= control target key end

     0   :  { %v3043_v47 = vmov 1983009808   ;;  %v559_v49 = vlaneseq  ;;  %vm3045_vm0 = vmmov 0   ;;  %vm1855_vm1 = vcmask 261120   ;;  %s4746_s1 = inlined_call_operand.vmem [shape: f32[4096,32], index: 1, kind: input, shape index: {}]   ;;  %s4747_s0 = inlined_call_operand.vmem [shape: f32[2,4096], index: 0, kind: input, shape index: {}]   ;;  %s4748_s2 = inlined_call_operand.vmem [shape: f32[1,32], index: 2, kind: input, shape index: {}]   ;;  %s4749_s3 = inlined_call_operand.vmem [shape: f32[32,128], index: 3, kind: input, shape index: {}]   ;;  %s4750_s4 = inlined_call_operand.vmem [shape: f32[1,128], index: 4, kind: input, shape index: {}]   ;;  %s4751_s5 = inlined_call_operand.vmem [shape: f32[2,128], index: 5, kind: output, shape index: {}]  }
   0x1   :  { %v36_v0 = vld [vmem:[%s4746_s1 + $0x80] sm:$0xff]  ;;  %v37_v1 = vld [vmem:[%s4746_s1 + $0x88] sm:$0xff]  ;;  %v38_v11 = vld [vmem:[%s4746_s1 + $0x90] sm:$0xff]  ;;  %v557_v48 = vunpack.c.l.s4 %v3043_v47 }
   0x2   :  { %v20_v2 = vld [vmem:[%s4746_s1] sm:$0xff]  ;;  %v2513_v3 = vpack.c.bf16 %v37_v1, %v36_v0  ;;  %v21_v4 = vld [vmem:[%s4746_s1 + $0x8] sm:$0xff]  ;;  %v39_v13 = vld [vmem:[%s4746_s1 + $0x98] sm:$0xff]  ;;  %v560_v0 = vshrl.u32 %v559_v49, 7 }
   0x3   :  { %v68_v5 = vld [vmem:[%s4746_s1 + $0x180] sm:$0xff]  ;;  %v69_v6 = vld [vmem:[%s4746_s1 + $0x188] sm:$0xff]  ;;  %v2515_v7 = vpack.c.bf16 %v21_v4, %v20_v2  ;;  %v22_v14 = vld [vmem:[%s4746_s1 + $0x10] sm:$0xff]  ;;  %v2517_v16 = vpack.c.bf16 %v39_v13, %v38_v11  ;;  %v558_v63 = vunpack.c.0.s8 %v557_v48 }
   0x4   :  { %v2545_v8 = vpack.c.bf16 %v69_v6, %v68_v5  ;;  %v52_v9 = vld [vmem:[%s4746_s1 + $0x100] sm:$0xff]  ;;  %v53_v10 = vld [vmem:[%s4746_s1 + $0x108] sm:$0xff]  ;;  %2514 = vmatprep.subr.bf16.mxu0 %v2513_v3  ;;  %v23_v15 = vld [vmem:[%s4746_s1 + $0x18] sm:$0xff] }
   0x5   :  { %v2547_v12 = vpack.c.bf16 %v53_v10, %v52_v9  ;;  %2516 = vmatpush3.bf16.msra.mxu0 %v2515_v7  ;;  %v2519_v17 = vpack.c.bf16 %v23_v15, %v22_v14  ;;  %v70_v18 = vld [vmem:[%s4746_s1 + $0x190] sm:$0xff]  ;;  %v71_v19 = vld [vmem:[%s4746_s1 + $0x198] sm:$0xff]  ;;  %v40_v23 = vld [vmem:[%s4746_s1 + $0xa0] sm:$0xff]  ;;  %v3227_v13 = vsub.s32 %v558_v63, %v560_v0 }
   0x6   :  { %2546 = vmatprep.subr.bf16.mxu1 %v2545_v8  ;;  %v54_v20 = vld [vmem:[%s4746_s1 + $0x110] sm:$0xff]  ;;  %v2549_v21 = vpack.c.bf16 %v71_v19, %v70_v18  ;;  %v55_v22 = vld [vmem:[%s4746_s1 + $0x118] sm:$0xff]  ;;  %v41_v24 = vld [vmem:[%s4746_s1 + $0xa8] sm:$0xff]  ;;  %2518 = vmatprep.subr.bf16.mxu0 %v2517_v16 }
   0x7   :  { %2548 = vmatpush3.bf16.msra.mxu1 %v2547_v12  ;;  %v2551_v25 = vpack.c.bf16 %v55_v22, %v54_v20  ;;  %v2521_v26 = vpack.c.bf16 %v41_v24, %v40_v23  ;;  %v24_v27 = vld [vmem:[%s4746_s1 + $0x20] sm:$0xff]  ;;  %v25_v28 = vld [vmem:[%s4746_s1 + $0x28] sm:$0xff]  ;;  %v42_v35 = vld [vmem:[%s4746_s1 + $0xb0] sm:$0xff] }
   0x8   :  { %v72_v29 = vld [vmem:[%s4746_s1 + $0x1a0] sm:$0xff]  ;;  %2550 = vmatprep.subr.bf16.mxu1 %v2549_v21  ;;  %v73_v30 = vld [vmem:[%s4746_s1 + $0x1a8] sm:$0xff]  ;;  %v2523_v33 = vpack.c.bf16 %v25_v28, %v24_v27  ;;  %v43_v36 = vld [vmem:[%s4746_s1 + $0xb8] sm:$0xff] }
   0x9   :  { %v56_v31 = vld [vmem:[%s4746_s1 + $0x120] sm:$0xff]  ;;  %v57_v32 = vld [vmem:[%s4746_s1 + $0x128] sm:$0xff]  ;;  %2520 = vmatpush3.bf16.msra.mxu0 %v2519_v17  ;;  %v2553_v34 = vpack.c.bf16 %v73_v30, %v72_v29  ;;  %v26_v37 = vld [vmem:[%s4746_s1 + $0x30] sm:$0xff]  ;;  %v2525_v39 = vpack.c.bf16 %v43_v36, %v42_v35 }
   0xa   :  { %2522 = vmatprep.subr.bf16.mxu0 %v2521_v26  ;;  %v2555_v38 = vpack.c.bf16 %v57_v32, %v56_v31  ;;  %v27_v40 = vld [vmem:[%s4746_s1 + $0x38] sm:$0xff]  ;;  %v74_v41 = vld [vmem:[%s4746_s1 + $0x1b0] sm:$0xff]  ;;  %v44_v46 = vld [vmem:[%s4746_s1 + $0xc0] sm:$0xff] }
   0xb   :  { %2552 = vmatpush3.bf16.msra.mxu1 %v2551_v25  ;;  %v75_v42 = vld [vmem:[%s4746_s1 + $0x1b8] sm:$0xff]  ;;  %v58_v44 = vld [vmem:[%s4746_s1 + $0x130] sm:$0xff]  ;;  %v45_v50 = vld [vmem:[%s4746_s1 + $0xc8] sm:$0xff]  ;;  %v2527_v51 = vpack.c.bf16 %v27_v40, %v26_v37 }
   0xc   :  { %2554 = vmatprep.subr.bf16.mxu1 %v2553_v34  ;;  %v2557_v43 = vpack.c.bf16 %v75_v42, %v74_v41  ;;  %v59_v45 = vld [vmem:[%s4746_s1 + $0x138] sm:$0xff]  ;;  %v76_v52 = vld [vmem:[%s4746_s1 + $0x1c0] sm:$0xff]  ;;  %v77_v53 = vld [vmem:[%s4746_s1 + $0x1c8] sm:$0xff]  ;;  %v2529_v55 = vpack.c.bf16 %v45_v50, %v44_v46 }
   0xd   :  { %2524 = vmatpush3.bf16.msra.mxu0 %v2523_v33  ;;  %v2559_v54 = vpack.c.bf16 %v59_v45, %v58_v44  ;;  %v28_v56 = vld [vmem:[%s4746_s1 + $0x40] sm:$0xff]  ;;  %v29_v57 = vld [vmem:[%s4746_s1 + $0x48] sm:$0xff]  ;;  %v2561_v59 = vpack.c.bf16 %v77_v53, %v76_v52  ;;  %v46_v61 = vld [vmem:[%s4746_s1 + $0xd0] sm:$0xff] }
   0xe   :  { %2526 = vmatprep.subr.bf16.mxu0 %v2525_v39  ;;  %v60_v58 = vld [vmem:[%s4746_s1 + $0x140] sm:$0xff]  ;;  %v61_v60 = vld [vmem:[%s4746_s1 + $0x148] sm:$0xff]  ;;  %v47_v62 = vld [vmem:[%s4746_s1 + $0xd8] sm:$0xff]  ;;  %v2531_v3 = vpack.c.bf16 %v29_v57, %v28_v56 }
   0xf   :  { %2556 = vmatpush3.bf16.msra.mxu1 %v2555_v38  ;;  %v78_v1 = vld [vmem:[%s4746_s1 + $0x1d0] sm:$0xff]  ;;  %v79_v2 = vld [vmem:[%s4746_s1 + $0x1d8] sm:$0xff]  ;;  %v2563_v4 = vpack.c.bf16 %v61_v60, %v60_v58  ;;  %v2533_v5 = vpack.c.bf16 %v47_v62, %v46_v61  ;;  %v48_v11 = vld [vmem:[%s4746_s1 + $0xe0] sm:$0xff] }
  0x10   :  { %2558 = vmatprep.subr.bf16.mxu1 %v2557_v43  ;;  %v30_v6 = vld [vmem:[%s4746_s1 + $0x50] sm:$0xff]  ;;  %v31_v7 = vld [vmem:[%s4746_s1 + $0x58] sm:$0xff]  ;;  %v2565_v9 = vpack.c.bf16 %v79_v2, %v78_v1  ;;  %v49_v12 = vld [vmem:[%s4746_s1 + $0xe8] sm:$0xff] }
  0x11   :  { %2528 = vmatpush3.bf16.msra.mxu0 %v2527_v51  ;;  %v62_v8 = vld [vmem:[%s4746_s1 + $0x150] sm:$0xff]  ;;  %v63_v10 = vld [vmem:[%s4746_s1 + $0x158] sm:$0xff]  ;;  %v80_v14 = vld [vmem:[%s4746_s1 + $0x1e0] sm:$0xff]  ;;  %v2535_v16 = vpack.c.bf16 %v31_v7, %v30_v6  ;;  %v2537_v19 = vpack.c.bf16 %v49_v12, %v48_v11 }
  0x12   :  { %2530 = vmatprep.subr.bf16.mxu0 %v2529_v55  ;;  %v81_v15 = vld [vmem:[%s4746_s1 + $0x1e8] sm:$0xff]  ;;  %v32_v17 = vld [vmem:[%s4746_s1 + $0x60] sm:$0xff]  ;;  %v2567_v18 = vpack.c.bf16 %v63_v10, %v62_v8  ;;  %v50_v25 = vld [vmem:[%s4746_s1 + $0xf0] sm:$0xff] }
  0x13   :  { %2560 = vmatpush3.bf16.msra.mxu1 %v2559_v54  ;;  %v33_v20 = vld [vmem:[%s4746_s1 + $0x68] sm:$0xff]  ;;  %v64_v21 = vld [vmem:[%s4746_s1 + $0x160] sm:$0xff]  ;;  %v2569_v23 = vpack.c.bf16 %v81_v15, %v80_v14  ;;  %v51_v26 = vld [vmem:[%s4746_s1 + $0xf8] sm:$0xff] }
  0x14   :  { %2562 = vmatprep.subr.bf16.mxu1 %v2561_v59  ;;  %v532_v22 = vld [vmem:[%s4747_s0] sm:$0xff]  ;;  %v65_v24 = vld [vmem:[%s4746_s1 + $0x168] sm:$0xff]  ;;  %v82_v29 = vld [vmem:[%s4746_s1 + $0x1f0] sm:$0xff]  ;;  %v2539_v31 = vpack.c.bf16 %v33_v20, %v32_v17  ;;  %v2541_v35 = vpack.c.bf16 %v51_v26, %v50_v25 }
  0x15   :  { %2532 = vmatpush3.bf16.msra.mxu0 %v2531_v3  ;;  %v562_v27 = vrot.slane %v532_v22, %v3227_v13  ;;  %v555_v28 = vcombine.high %v532_v22, %v532_v22  ;;  %v83_v30 = vld [vmem:[%s4746_s1 + $0x1f8] sm:$0xff]  ;;  %v2571_v34 = vpack.c.bf16 %v65_v24, %v64_v21  ;;  %v34_v36 = vld [vmem:[%s4746_s1 + $0x70] sm:$0xff]  ;;  %v100_v41 = vld [vmem:[%s4746_s1 + $0x280] sm:$0xff] }
  0x16   :  { %2534 = vmatprep.subr.bf16.mxu0 %v2533_v5  ;;  %v35_v37 = vld [vmem:[%s4746_s1 + $0x78] sm:$0xff]  ;;  %v66_v38 = vld [vmem:[%s4746_s1 + $0x170] sm:$0xff]  ;;  %v2573_v39 = vpack.c.bf16 %v83_v30, %v82_v29  ;;  %v101_v42 = vld [vmem:[%s4746_s1 + $0x288] sm:$0xff] }
  0x17   :  { %2564 = vmatpush3.bf16.msra.mxu1 %v2563_v4  ;;  %v570_v32 = vcombine.high %v562_v27, %v562_v27  ;;  %v569_v33 = vrot.slane %v555_v28, %v3227_v13  ;;  %v67_v40 = vld [vmem:[%s4746_s1 + $0x178] sm:$0xff]  ;;  %v132_v44 = vld [vmem:[%s4746_s1 + $0x380] sm:$0xff]  ;;  %v133_v45 = vld [vmem:[%s4746_s1 + $0x388] sm:$0xff]  ;;  %v2543_v46 = vpack.c.bf16 %v35_v37, %v34_v36  ;;  %v2577_v48 = vpack.c.bf16 %v101_v42, %v100_v41 }
  0x18   :  { %2566 = vmatprep.subr.bf16.mxu1 %v2565_v9  ;;  %v2575_v47 = vpack.c.bf16 %v67_v40, %v66_v38  ;;  %v84_v49 = vld [vmem:[%s4746_s1 + $0x200] sm:$0xff]  ;;  %v85_v50 = vld [vmem:[%s4746_s1 + $0x208] sm:$0xff]  ;;  %v2609_v52 = vpack.c.bf16 %v133_v45, %v132_v44  ;;  %v102_v54 = vld [vmem:[%s4746_s1 + $0x290] sm:$0xff] }
  0x19   :  { %2536 = vmatpush3.bf16.msra.mxu0 %v2535_v16  ;;  %787 = vmatprep.mubr.f32.mxu0 %v570_v32  ;;  %v571_v43 = vcombine.high %v569_v33, %v569_v33  ;;  %v116_v51 = vld [vmem:[%s4746_s1 + $0x300] sm:$0xff]  ;;  %v117_v53 = vld [vmem:[%s4746_s1 + $0x308] sm:$0xff]  ;;  %v103_v55 = vld [vmem:[%s4746_s1 + $0x298] sm:$0xff]  ;;  %v2579_v58 = vpack.c.bf16 %v85_v50, %v84_v49 }
  0x1a   :  { %2538 = vmatprep.subr.bf16.mxu0 %v2537_v19  ;;  %v134_v56 = vld [vmem:[%s4746_s1 + $0x390] sm:$0xff]  ;;  %v135_v57 = vld [vmem:[%s4746_s1 + $0x398] sm:$0xff]  ;;  %v2611_v59 = vpack.c.bf16 %v117_v53, %v116_v51  ;;  %v2581_v60 = vpack.c.bf16 %v103_v55, %v102_v54  ;;  %v104_v2 = vld [vmem:[%s4746_s1 + $0x2a0] sm:$0xff] }
  0x1b   :  { %2568 = vmatpush3.bf16.msra.mxu1 %v2567_v18  ;;  %857 = vmatprep.mubr.f32.mxu1 %v571_v43  ;;  %v86_v61 = vld [vmem:[%s4746_s1 + $0x210] sm:$0xff]  ;;  %v87_v62 = vld [vmem:[%s4746_s1 + $0x218] sm:$0xff]  ;;  %v2613_v0 = vpack.c.bf16 %v135_v57, %v134_v56  ;;  %v105_v3 = vld [vmem:[%s4746_s1 + $0x2a8] sm:$0xff] }
  0x1c   :  { %2570 = vmatprep.subr.bf16.mxu1 %v2569_v23  ;;  %v118_v63 = vld [vmem:[%s4746_s1 + $0x310] sm:$0xff]  ;;  %v119_v1 = vld [vmem:[%s4746_s1 + $0x318] sm:$0xff]  ;;  %v136_v4 = vld [vmem:[%s4746_s1 + $0x3a0] sm:$0xff]  ;;  %v2583_v6 = vpack.c.bf16 %v87_v62, %v86_v61  ;;  %v2585_v8 = vpack.c.bf16 %v105_v3, %v104_v2 }
  0x1d   :  { %2540 = vmatpush3.bf16.msra.mxu0 %v2539_v31  ;;  %v137_v5 = vld [vmem:[%s4746_s1 + $0x3a8] sm:$0xff]  ;;  %v2615_v7 = vpack.c.bf16 %v119_v1, %v118_v63  ;;  %v88_v9 = vld [vmem:[%s4746_s1 + $0x220] sm:$0xff]  ;;  %v106_v15 = vld [vmem:[%s4746_s1 + $0x2b0] sm:$0xff] }
  0x1e   :  { %2542 = vmatprep.subr.bf16.mxu0 %v2541_v35  ;;  %v89_v10 = vld [vmem:[%s4746_s1 + $0x228] sm:$0xff]  ;;  %v120_v11 = vld [vmem:[%s4746_s1 + $0x320] sm:$0xff]  ;;  %v2617_v12 = vpack.c.bf16 %v137_v5, %v136_v4  ;;  %v107_v16 = vld [vmem:[%s4746_s1 + $0x2b8] sm:$0xff] }
  0x1f   :  { %2572 = vmatpush3.bf16.msra.mxu1 %v2571_v34  ;;  %v121_v14 = vld [vmem:[%s4746_s1 + $0x328] sm:$0xff]  ;;  %v138_v17 = vld [vmem:[%s4746_s1 + $0x3b0] sm:$0xff]  ;;  %v139_v18 = vld [vmem:[%s4746_s1 + $0x3b8] sm:$0xff]  ;;  %v2587_v19 = vpack.c.bf16 %v89_v10, %v88_v9  ;;  %v2589_v21 = vpack.c.bf16 %v107_v16, %v106_v15 }
  0x20   :  { %2574 = vmatprep.subr.bf16.mxu1 %v2573_v39  ;;  %v2619_v20 = vpack.c.bf16 %v121_v14, %v120_v11  ;;  %v90_v22 = vld [vmem:[%s4746_s1 + $0x230] sm:$0xff]  ;;  %v91_v23 = vld [vmem:[%s4746_s1 + $0x238] sm:$0xff]  ;;  %v2621_v25 = vpack.c.bf16 %v139_v18, %v138_v17  ;;  %v109_v28 = vld [vmem:[%s4746_s1 + $0x2c8] sm:$0xff] }
  0x21   :  { %2544 = vmatpush3.bf16.msra.mxu0 %v2543_v46  ;;  %v122_v24 = vld [vmem:[%s4746_s1 + $0x330] sm:$0xff]  ;;  %v123_v26 = vld [vmem:[%s4746_s1 + $0x338] sm:$0xff]  ;;  %v140_v29 = vld [vmem:[%s4746_s1 + $0x3c0] sm:$0xff]  ;;  %v2591_v32 = vpack.c.bf16 %v91_v23, %v90_v22 }
  0x22   :  { %2578 = vmatprep.subr.bf16.mxu0 %v2577_v48  ;;  %v141_v30 = vld [vmem:[%s4746_s1 + $0x3c8] sm:$0xff]  ;;  %v2623_v35 = vpack.c.bf16 %v123_v26, %v122_v24  ;;  %v92_v37 = vld [vmem:[%s4746_s1 + $0x240] sm:$0xff]  ;;  %v110_v42 = vld [vmem:[%s4746_s1 + $0x2d0] sm:$0xff] }
  0x23   :  { %2576 = vmatpush3.bf16.msra.mxu1 %v2575_v47  ;;  %v533_v31 = vld [vmem:[%s4747_s0 + $0x8] sm:$0xff]  ;;  %v124_v39 = vld [vmem:[%s4746_s1 + $0x340] sm:$0xff]  ;;  %v2625_v40 = vpack.c.bf16 %v141_v30, %v140_v29  ;;  %v111_v43 = vld [vmem:[%s4746_s1 + $0x2d8] sm:$0xff] }
  0x24   :  { %2610 = vmatprep.subr.bf16.mxu1 %v2609_v52  ;;  %788 = vmatmul.mubr.f32.vlgmr.msra.gmra.mrb[0].mxu0 %v562_v27  ;;  %v108_v27 = vld [vmem:[%s4746_s1 + $0x2c0] sm:$0xff]  ;;  %v572_v34 = vcombine.high %v533_v31, %v533_v31  ;;  %v93_v38 = vld [vmem:[%s4746_s1 + $0x248] sm:$0xff]  ;;  %v142_v46 = vld [vmem:[%s4746_s1 + $0x3d0] sm:$0xff]  ;;  %v2597_v51 = vpack.c.bf16 %v111_v43, %v110_v42 }
  0x25   :  { %2580 = vmatpush3.bf16.msra.mxu0 %v2579_v58  ;;  %v2593_v36 = vpack.c.bf16 %v109_v28, %v108_v27  ;;  %v125_v41 = vld [vmem:[%s4746_s1 + $0x348] sm:$0xff]  ;;  %v143_v47 = vld [vmem:[%s4746_s1 + $0x3d8] sm:$0xff]  ;;  %v2595_v48 = vpack.c.bf16 %v93_v38, %v92_v37  ;;  %v94_v52 = vld [vmem:[%s4746_s1 + $0x250] sm:$0xff] }
  0x26   :  { %858 = vmatmul.mubr.f32.vlgmr.msra.gmra.mrb[0].mxu1 %v569_v33  ;;  %2582 = vmatprep.subr.bf16.mxu0 %v2581_v60  ;;  %v3388_v33 = vrot.slane %v533_v31, %v3227_v13  ;;  %v3411_v45 = vrot.slane %v572_v34, %v3227_v13  ;;  %v2627_v50 = vpack.c.bf16 %v125_v41, %v124_v39  ;;  %v95_v53 = vld [vmem:[%s4746_s1 + $0x258] sm:$0xff]  ;;  %v126_v54 = vld [vmem:[%s4746_s1 + $0x350] sm:$0xff]  ;;  %v112_v57 = vld [vmem:[%s4746_s1 + $0x2e0] sm:$0xff] }
  0x27   :  { %2612 = vmatpush3.bf16.msra.mxu1 %v2611_v59  ;;  %v2629_v55 = vpack.c.bf16 %v143_v47, %v142_v46  ;;  %v127_v56 = vld [vmem:[%s4746_s1 + $0x358] sm:$0xff]  ;;  %v113_v58 = vld [vmem:[%s4746_s1 + $0x2e8] sm:$0xff]  ;;  %v144_v59 = vld [vmem:[%s4746_s1 + $0x3e0] sm:$0xff]  ;;  %v2599_v61 = vpack.c.bf16 %v95_v53, %v94_v52 }
  0x28   :  { %2614 = vmatprep.subr.bf16.mxu1 %v2613_v0  ;;  %v587_v44 = vcombine.high %v3388_v33, %v3388_v33  ;;  %v588_v49 = vcombine.high %v3411_v45, %v3411_v45  ;;  %v145_v60 = vld [vmem:[%s4746_s1 + $0x3e8] sm:$0xff]  ;;  %v2631_v62 = vpack.c.bf16 %v127_v56, %v126_v54  ;;  %v2601_v63 = vpack.c.bf16 %v113_v58, %v112_v57  ;;  %v96_v0 = vld [vmem:[%s4746_s1 + $0x260] sm:$0xff]  ;;  %v114_v5 = vld [vmem:[%s4746_s1 + $0x2f0] sm:$0xff] }
  0x29   :  { %2584 = vmatpush3.bf16.msra.mxu0 %v2583_v6  ;;  %v97_v1 = vld [vmem:[%s4746_s1 + $0x268] sm:$0xff]  ;;  %v128_v2 = vld [vmem:[%s4746_s1 + $0x360] sm:$0xff]  ;;  %v2633_v3 = vpack.c.bf16 %v145_v60, %v144_v59  ;;  %v115_v6 = vld [vmem:[%s4746_s1 + $0x2f8] sm:$0xff] }
  0x2a   :  { %2586 = vmatprep.subr.bf16.mxu0 %v2585_v8  ;;  %927 = vmatprep.mubr.f32.mxu0 %v587_v44  ;;  %v129_v4 = vld [vmem:[%s4746_s1 + $0x368] sm:$0xff]  ;;  %v147_v8 = vld [vmem:[%s4746_s1 + $0x3f8] sm:$0xff]  ;;  %v2603_v9 = vpack.c.bf16 %v97_v1, %v96_v0  ;;  %v2605_v11 = vpack.c.bf16 %v115_v6, %v114_v5  ;;  %v130_v15 = vld [vmem:[%s4746_s1 + $0x370] sm:$0xff] }
  0x2b   :  { %2616 = vmatpush3.bf16.msra.mxu1 %v2615_v7  ;;  %997 = vmatprep.mubr.f32.mxu1 %v588_v49  ;;  %v146_v7 = vld [vmem:[%s4746_s1 + $0x3f0] sm:$0xff]  ;;  %v2635_v10 = vpack.c.bf16 %v129_v4, %v128_v2  ;;  %v99_v14 = vld [vmem:[%s4746_s1 + $0x278] sm:$0xff]  ;;  %v164_v18 = vld [vmem:[%s4746_s1 + $0x480] sm:$0xff] }
  0x2c   :  { %2618 = vmatprep.subr.bf16.mxu1 %v2617_v12  ;;  %v98_v12 = vld [vmem:[%s4746_s1 + $0x270] sm:$0xff]  ;;  %v2637_v16 = vpack.c.bf16 %v147_v8, %v146_v7  ;;  %v131_v17 = vld [vmem:[%s4746_s1 + $0x378] sm:$0xff]  ;;  %v148_v23 = vld [vmem:[%s4746_s1 + $0x400] sm:$0xff] }
  0x2d   :  { %2588 = vmatpush3.bf16.msra.mxu0 %v2587_v19  ;;  %v165_v19 = vld [vmem:[%s4746_s1 + $0x488] sm:$0xff]  ;;  %v2607_v22 = vpack.c.bf16 %v99_v14, %v98_v12  ;;  %v2639_v24 = vpack.c.bf16 %v131_v17, %v130_v15  ;;  %v180_v27 = vld [vmem:[%s4746_s1 + $0x500] sm:$0xff]  ;;  %v166_v30 = vld [vmem:[%s4746_s1 + $0x490] sm:$0xff] }
  0x2e   :  { %2590 = vmatprep.subr.bf16.mxu0 %v2589_v21  ;;  %v197_v21 = vld [vmem:[%s4746_s1 + $0x588] sm:$0xff]  ;;  %v167_v31 = vld [vmem:[%s4746_s1 + $0x498] sm:$0xff]  ;;  %v534_v37 = vld [vmem:[%s4747_s0 + $0x10] sm:$0xff] }
  0x2f   :  { %2620 = vmatpush3.bf16.msra.mxu1 %v2619_v20  ;;  %v196_v20 = vld [vmem:[%s4746_s1 + $0x580] sm:$0xff]  ;;  %v149_v26 = vld [vmem:[%s4746_s1 + $0x408] sm:$0xff]  ;;  %v199_v34 = vld [vmem:[%s4746_s1 + $0x598] sm:$0xff]  ;;  %v2645_v38 = vpack.c.bf16 %v167_v31, %v166_v30  ;;  %v3530_v42 = vrot.slane %v534_v37, %v3227_v13  ;;  %v589_v43 = vcombine.high %v534_v37, %v534_v37 }
  0x30   :  { %2622 = vmatprep.subr.bf16.mxu1 %v2621_v25  ;;  %v2641_v25 = vpack.c.bf16 %v165_v19, %v164_v18  ;;  %v181_v28 = vld [vmem:[%s4746_s1 + $0x508] sm:$0xff]  ;;  %v2673_v29 = vpack.c.bf16 %v197_v21, %v196_v20  ;;  %v150_v39 = vld [vmem:[%s4746_s1 + $0x410] sm:$0xff]  ;;  %v183_v46 = vld [vmem:[%s4746_s1 + $0x518] sm:$0xff] }
  0x31   :  { %2592 = vmatpush3.bf16.msra.mxu0 %v2591_v32  ;;  %v198_v32 = vld [vmem:[%s4746_s1 + $0x590] sm:$0xff]  ;;  %v168_v47 = vld [vmem:[%s4746_s1 + $0x4a0] sm:$0xff]  ;;  %v3551_v52 = vrot.slane %v589_v43, %v3227_v13  ;;  %v153_v56 = vld [vmem:[%s4746_s1 + $0x428] sm:$0xff] }
  0x32   :  { %2594 = vmatprep.subr.bf16.mxu0 %v2593_v36  ;;  %v2675_v36 = vpack.c.bf16 %v181_v28, %v180_v27  ;;  %v182_v41 = vld [vmem:[%s4746_s1 + $0x510] sm:$0xff]  ;;  %v2677_v44 = vpack.c.bf16 %v199_v34, %v198_v32  ;;  %v200_v49 = vld [vmem:[%s4746_s1 + $0x5a0] sm:$0xff]  ;;  %v185_v59 = vld [vmem:[%s4746_s1 + $0x528] sm:$0xff] }
  0x33   :  { %2624 = vmatpush3.bf16.msra.mxu1 %v2623_v35  ;;  %v2643_v35 = vpack.c.bf16 %v149_v26, %v148_v23  ;;  %v184_v57 = vld [vmem:[%s4746_s1 + $0x520] sm:$0xff]  ;;  %v170_v60 = vld [vmem:[%s4746_s1 + $0x4b0] sm:$0xff]  ;;  %v155_v4 = vld [vmem:[%s4746_s1 + $0x438] sm:$0xff] }
  0x34   :  { %2626 = vmatprep.subr.bf16.mxu1 %v2625_v40  ;;  %v151_v40 = vld [vmem:[%s4746_s1 + $0x418] sm:$0xff]  ;;  %v2683_v1 = vpack.c.bf16 %v185_v59, %v184_v57  ;;  %v186_v5 = vld [vmem:[%s4746_s1 + $0x530] sm:$0xff]  ;;  %v172_v8 = vld [vmem:[%s4746_s1 + $0x4c0] sm:$0xff] }
  0x35   :  { %2596 = vmatpush3.bf16.msra.mxu0 %v2595_v48  ;;  %v169_v48 = vld [vmem:[%s4746_s1 + $0x4a8] sm:$0xff]  ;;  %v2647_v53 = vpack.c.bf16 %v151_v40, %v150_v39  ;;  %v187_v7 = vld [vmem:[%s4746_s1 + $0x538] sm:$0xff]  ;;  %v188_v18 = vld [vmem:[%s4746_s1 + $0x540] sm:$0xff] }
  0x36   :  { %2598 = vmatprep.subr.bf16.mxu0 %v2597_v51  ;;  %v604_v51 = vcombine.high %v3530_v42, %v3530_v42  ;;  %v2649_v54 = vpack.c.bf16 %v169_v48, %v168_v47  ;;  %v2687_v14 = vpack.c.bf16 %v187_v7, %v186_v5  ;;  %v157_v17 = vld [vmem:[%s4746_s1 + $0x448] sm:$0xff]  ;;  %v174_v21 = vld [vmem:[%s4746_s1 + $0x4d0] sm:$0xff]  ;;  %v191_v32 = vld [vmem:[%s4746_s1 + $0x558] sm:$0xff] }
  0x37   :  { %2628 = vmatpush3.bf16.msra.mxu1 %v2627_v50  ;;  %v201_v50 = vld [vmem:[%s4746_s1 + $0x5a8] sm:$0xff]  ;;  %v206_v23 = vld [vmem:[%s4746_s1 + $0x5d0] sm:$0xff]  ;;  %v176_v34 = vld [vmem:[%s4746_s1 + $0x4e0] sm:$0xff] }
  0x38   :  { %2630 = vmatprep.subr.bf16.mxu1 %v2629_v55  ;;  %v152_v55 = vld [vmem:[%s4746_s1 + $0x420] sm:$0xff]  ;;  %v2681_v58 = vpack.c.bf16 %v201_v50, %v200_v49  ;;  %v189_v20 = vld [vmem:[%s4746_s1 + $0x548] sm:$0xff]  ;;  %v158_v28 = vld [vmem:[%s4746_s1 + $0x450] sm:$0xff] }
  0x39   :  { %2600 = vmatpush3.bf16.msra.mxu0 %v2599_v61  ;;  %v171_v61 = vld [vmem:[%s4746_s1 + $0x4b8] sm:$0xff]  ;;  %v2651_v0 = vpack.c.bf16 %v153_v56, %v152_v55  ;;  %v2691_v26 = vpack.c.bf16 %v189_v20, %v188_v18  ;;  %v190_v30 = vld [vmem:[%s4746_s1 + $0x550] sm:$0xff]  ;;  %v209_v37 = vld [vmem:[%s4746_s1 + $0x5e8] sm:$0xff] }
  0x3a   :  { %2602 = vmatprep.subr.bf16.mxu0 %v2601_v63  ;;  %v203_v63 = vld [vmem:[%s4746_s1 + $0x5b8] sm:$0xff]  ;;  %v2653_v2 = vpack.c.bf16 %v171_v61, %v170_v60  ;;  %v2695_v39 = vpack.c.bf16 %v191_v32, %v190_v30  ;;  %v161_v43 = vld [vmem:[%s4746_s1 + $0x468] sm:$0xff]  ;;  %v178_v48 = vld [vmem:[%s4746_s1 + $0x4f0] sm:$0xff] }
  0x3b   :  { %2632 = vmatpush3.bf16.msra.mxu1 %v2631_v62  ;;  %v202_v62 = vld [vmem:[%s4746_s1 + $0x5b0] sm:$0xff]  ;;  %v193_v47 = vld [vmem:[%s4746_s1 + $0x568] sm:$0xff]  ;;  %v179_v49 = vld [vmem:[%s4746_s1 + $0x4f8] sm:$0xff] }
  0x3c   :  { %2634 = vmatprep.subr.bf16.mxu1 %v2633_v3  ;;  %v154_v3 = vld [vmem:[%s4746_s1 + $0x430] sm:$0xff]  ;;  %v2685_v6 = vpack.c.bf16 %v203_v63, %v202_v62  ;;  %v2669_v55 = vpack.c.bf16 %v179_v49, %v178_v48  ;;  %v163_v57 = vld [vmem:[%s4746_s1 + $0x478] sm:$0xff]  ;;  %v228_v60 = vld [vmem:[%s4746_s1 + $0x680] sm:$0xff] }
  0x3d   :  { %2604 = vmatpush3.bf16.msra.mxu0 %v2603_v9  ;;  %v173_v9 = vld [vmem:[%s4746_s1 + $0x4c8] sm:$0xff]  ;;  %v2655_v12 = vpack.c.bf16 %v155_v4, %v154_v3  ;;  %v210_v50 = vld [vmem:[%s4746_s1 + $0x5f0] sm:$0xff]  ;;  %v195_v59 = vld [vmem:[%s4746_s1 + $0x578] sm:$0xff] }
  0x3e   :  { %2606 = vmatprep.subr.bf16.mxu0 %v2605_v11  ;;  %v205_v11 = vld [vmem:[%s4746_s1 + $0x5c8] sm:$0xff]  ;;  %v2657_v15 = vpack.c.bf16 %v173_v9, %v172_v8  ;;  %v162_v56 = vld [vmem:[%s4746_s1 + $0x470] sm:$0xff]  ;;  %v260_v62 = vld [vmem:[%s4746_s1 + $0x780] sm:$0xff] }
  0x3f   :  { %2636 = vmatpush3.bf16.msra.mxu1 %v2635_v10  ;;  %v204_v10 = vld [vmem:[%s4746_s1 + $0x5c0] sm:$0xff]  ;;  %v229_v61 = vld [vmem:[%s4746_s1 + $0x688] sm:$0xff]  ;;  %v230_v9 = vld [vmem:[%s4746_s1 + $0x690] sm:$0xff] }
  0x40   :  { %2638 = vmatprep.subr.bf16.mxu1 %v2637_v16  ;;  %v156_v16 = vld [vmem:[%s4746_s1 + $0x440] sm:$0xff]  ;;  %v2689_v19 = vpack.c.bf16 %v205_v11, %v204_v10  ;;  %v261_v63 = vld [vmem:[%s4746_s1 + $0x788] sm:$0xff]  ;;  %v2705_v3 = vpack.c.bf16 %v229_v61, %v228_v60  ;;  %v231_v10 = vld [vmem:[%s4746_s1 + $0x698] sm:$0xff] }
  0x41   :  { %2608 = vmatpush3.bf16.msra.mxu0 %v2607_v22  ;;  %v175_v22 = vld [vmem:[%s4746_s1 + $0x4d8] sm:$0xff]  ;;  %v212_v4 = vld [vmem:[%s4746_s1 + $0x600] sm:$0xff]  ;;  %v213_v5 = vld [vmem:[%s4746_s1 + $0x608] sm:$0xff]  ;;  %v2737_v7 = vpack.c.bf16 %v261_v63, %v260_v62  ;;  %v2709_v18 = vpack.c.bf16 %v231_v10, %v230_v9 }
  0x42   :  { %2642 = vmatprep.subr.bf16.mxu0 %v2641_v25  ;;  %v2659_v25 = vpack.c.bf16 %v157_v17, %v156_v16  ;;  %v2661_v27 = vpack.c.bf16 %v175_v22, %v174_v21  ;;  %v245_v8 = vld [vmem:[%s4746_s1 + $0x708] sm:$0xff]  ;;  %v2707_v16 = vpack.c.bf16 %v213_v5, %v212_v4  ;;  %v215_v20 = vld [vmem:[%s4746_s1 + $0x618] sm:$0xff]  ;;  %v246_v21 = vld [vmem:[%s4746_s1 + $0x710] sm:$0xff] }
  0x43   :  { %2640 = vmatpush3.bf16.msra.mxu1 %v2639_v24  ;;  %v207_v24 = vld [vmem:[%s4746_s1 + $0x5d8] sm:$0xff]  ;;  %v250_v48 = vld [vmem:[%s4746_s1 + $0x730] sm:$0xff]  ;;  %v253_v61 = vld [vmem:[%s4746_s1 + $0x748] sm:$0xff] }
  0x44   :  { %2674 = vmatprep.subr.bf16.mxu1 %v2673_v29  ;;  %928 = vmatmul.mubr.f32.vlgmr.msra.gmra.mrb[2].mxu0 %v3388_v33  ;;  %v2679_v33 = vpack.c.bf16 %v183_v46, %v182_v41  ;;  %v159_v29 = vld [vmem:[%s4746_s1 + $0x458] sm:$0xff]  ;;  %v2693_v31 = vpack.c.bf16 %v207_v24, %v206_v23  ;;  %v160_v41 = vld [vmem:[%s4746_s1 + $0x460] sm:$0xff]  ;;  %v238_v62 = vld [vmem:[%s4746_s1 + $0x6d0] sm:$0xff] }
  0x45   :  { %2644 = vmatpush3.bf16.msra.mxu0 %v2643_v35  ;;  %1067 = vmatprep.mubr.f32.mxu0 %v604_v51  ;;  %v177_v35 = vld [vmem:[%s4746_s1 + $0x4e8] sm:$0xff]  ;;  %v211_v51 = vld [vmem:[%s4746_s1 + $0x5f8] sm:$0xff]  ;;  %v232_v24 = vld [vmem:[%s4746_s1 + $0x6a0] sm:$0xff] }
  0x46   :  { %998 = vmatmul.mubr.f32.vlgmr.msra.gmra.mrb[2].mxu1 %v3411_v45  ;;  %2646 = vmatprep.subr.bf16.mxu0 %v2645_v38  ;;  %v605_v45 = vcombine.high %v3551_v52, %v3551_v52  ;;  %v2663_v38 = vpack.c.bf16 %v159_v29, %v158_v28  ;;  %v2665_v40 = vpack.c.bf16 %v177_v35, %v176_v34  ;;  %v247_v23 = vld [vmem:[%s4746_s1 + $0x718] sm:$0xff]  ;;  %v265_v28 = vld [vmem:[%s4746_s1 + $0x7a8] sm:$0xff]  ;;  %v248_v35 = vld [vmem:[%s4746_s1 + $0x720] sm:$0xff] }
  0x47   :  { %2676 = vmatpush3.bf16.msra.mxu1 %v2675_v36  ;;  %v208_v36 = vld [vmem:[%s4746_s1 + $0x5e0] sm:$0xff]  ;;  %v217_v34 = vld [vmem:[%s4746_s1 + $0x628] sm:$0xff]  ;;  %v239_v63 = vld [vmem:[%s4746_s1 + $0x6d8] sm:$0xff] }
  0x48   :  { %2678 = vmatprep.subr.bf16.mxu1 %v2677_v44  ;;  %1137 = vmatprep.mubr.f32.mxu1 %v605_v45  ;;  %v192_v44 = vld [vmem:[%s4746_s1 + $0x560] sm:$0xff]  ;;  %v2697_v46 = vpack.c.bf16 %v209_v37, %v208_v36  ;;  %v194_v45 = vld [vmem:[%s4746_s1 + $0x570] sm:$0xff]  ;;  %v2725_v4 = vpack.c.bf16 %v239_v63, %v238_v62  ;;  %v255_v9 = vld [vmem:[%s4746_s1 + $0x758] sm:$0xff] }
  0x49   :  { %2648 = vmatpush3.bf16.msra.mxu0 %v2647_v53  ;;  %v2667_v53 = vpack.c.bf16 %v161_v43, %v160_v41  ;;  %v234_v37 = vld [vmem:[%s4746_s1 + $0x6b0] sm:$0xff]  ;;  %v240_v10 = vld [vmem:[%s4746_s1 + $0x6e0] sm:$0xff] }
  0x4a   :  { %2650 = vmatprep.subr.bf16.mxu0 %v2649_v54  ;;  %v2699_v54 = vpack.c.bf16 %v193_v47, %v192_v44  ;;  %v219_v47 = vld [vmem:[%s4746_s1 + $0x638] sm:$0xff]  ;;  %v222_v5 = vld [vmem:[%s4746_s1 + $0x650] sm:$0xff] }
  0x4b   :  { %2680 = vmatpush3.bf16.msra.mxu1 %v2679_v33  ;;  %v535_v33 = vld [vmem:[%s4747_s0 + $0x18] sm:$0xff]  ;;  %v310_v62 = vld [vmem:[%s4746_s1 + $0x910] sm:$0xff] }
  0x4c   :  { %2682 = vmatprep.subr.bf16.mxu1 %v2681_v58  ;;  %v2701_v58 = vpack.c.bf16 %v211_v51, %v210_v50  ;;  %v3722_v11 = vrot.slane %v535_v33, %v3227_v13  ;;  %v251_v50 = vld [vmem:[%s4746_s1 + $0x738] sm:$0xff]  ;;  %v236_v51 = vld [vmem:[%s4746_s1 + $0x6c0] sm:$0xff] }
  0x4d   :  { %2652 = vmatpush3.bf16.msra.mxu0 %v2651_v0  ;;  %v606_v0 = vcombine.high %v535_v33, %v535_v33  ;;  %v268_v33 = vld [vmem:[%s4746_s1 + $0x7c0] sm:$0xff] }
  0x4e   :  { %2654 = vmatprep.subr.bf16.mxu0 %v2653_v2  ;;  %v2703_v2 = vpack.c.bf16 %v195_v59, %v194_v45  ;;  %v220_v45 = vld [vmem:[%s4746_s1 + $0x640] sm:$0xff] }
  0x4f   :  { %2684 = vmatpush3.bf16.msra.mxu1 %v2683_v1  ;;  %v2671_v1 = vpack.c.bf16 %v163_v57, %v162_v56  ;;  %v2751_v56 = vpack.c.bf16 %v251_v50, %v250_v48  ;;  %v252_v59 = vld [vmem:[%s4746_s1 + $0x740] sm:$0xff]  ;;  %v277_v48 = vld [vmem:[%s4746_s1 + $0x808] sm:$0xff] }
  0x50   :  { %2686 = vmatprep.subr.bf16.mxu1 %v2685_v6  ;;  %v244_v6 = vld [vmem:[%s4746_s1 + $0x700] sm:$0xff] }
  0x51   :  { %2656 = vmatpush3.bf16.msra.mxu0 %v2655_v12  ;;  %v262_v12 = vld [vmem:[%s4746_s1 + $0x790] sm:$0xff]  ;;  %v2739_v17 = vpack.c.bf16 %v245_v8, %v244_v6  ;;  %v223_v6 = vld [vmem:[%s4746_s1 + $0x658] sm:$0xff] }
  0x52   :  { %2658 = vmatprep.subr.bf16.mxu0 %v2657_v15  ;;  %v3731_v15 = vrot.slane %v606_v0, %v3227_v13  ;;  %v270_v0 = vld [vmem:[%s4746_s1 + $0x7d0] sm:$0xff] }
  0x53   :  { %2688 = vmatpush3.bf16.msra.mxu1 %v2687_v14  ;;  %v263_v14 = vld [vmem:[%s4746_s1 + $0x798] sm:$0xff] }
  0x54   :  { %2690 = vmatprep.subr.bf16.mxu1 %v2689_v19  ;;  %v214_v19 = vld [vmem:[%s4746_s1 + $0x610] sm:$0xff]  ;;  %v2741_v22 = vpack.c.bf16 %v263_v14, %v262_v12  ;;  %v622_v29 = vcombine.high %v3731_v15, %v3731_v15  ;;  %v241_v12 = vld [vmem:[%s4746_s1 + $0x6e8] sm:$0xff]  ;;  %v272_v14 = vld [vmem:[%s4746_s1 + $0x7e0] sm:$0xff] }
  0x55   :  { %2660 = vmatpush3.bf16.msra.mxu0 %v2659_v25  ;;  %v233_v25 = vld [vmem:[%s4746_s1 + $0x6a8] sm:$0xff]  ;;  %v2711_v30 = vpack.c.bf16 %v215_v20, %v214_v19  ;;  %v2729_v19 = vpack.c.bf16 %v241_v12, %v240_v10  ;;  %v224_v20 = vld [vmem:[%s4746_s1 + $0x660] sm:$0xff] }
  0x56   :  { %2662 = vmatprep.subr.bf16.mxu0 %v2661_v27  ;;  %v264_v27 = vld [vmem:[%s4746_s1 + $0x7a0] sm:$0xff]  ;;  %v2713_v32 = vpack.c.bf16 %v233_v25, %v232_v24  ;;  %v257_v24 = vld [vmem:[%s4746_s1 + $0x768] sm:$0xff]  ;;  %v242_v25 = vld [vmem:[%s4746_s1 + $0x6f0] sm:$0xff] }
  0x57   :  { %2692 = vmatpush3.bf16.msra.mxu1 %v2691_v26  ;;  %v621_v26 = vcombine.high %v3722_v11, %v3722_v11  ;;  %v2745_v36 = vpack.c.bf16 %v265_v28, %v264_v27  ;;  %v274_v27 = vld [vmem:[%s4746_s1 + $0x7f0] sm:$0xff]  ;;  %v275_v28 = vld [vmem:[%s4746_s1 + $0x7f8] sm:$0xff]  ;;  %v281_v10 = vld [vmem:[%s4746_s1 + $0x828] sm:$0xff] }
  0x58   :  { %2694 = vmatprep.subr.bf16.mxu1 %v2693_v31  ;;  %v2743_v31 = vpack.c.bf16 %v247_v23, %v246_v21  ;;  %v225_v21 = vld [vmem:[%s4746_s1 + $0x668] sm:$0xff]  ;;  %v312_v12 = vld [vmem:[%s4746_s1 + $0x920] sm:$0xff] }
  0x59   :  { %2664 = vmatpush3.bf16.msra.mxu0 %v2663_v38  ;;  %v235_v38 = vld [vmem:[%s4746_s1 + $0x6b8] sm:$0xff] }
  0x5a   :  { %2666 = vmatprep.subr.bf16.mxu0 %v2665_v40  ;;  %v267_v40 = vld [vmem:[%s4746_s1 + $0x7b8] sm:$0xff]  ;;  %v2717_v44 = vpack.c.bf16 %v235_v38, %v234_v37  ;;  %v292_v37 = vld [vmem:[%s4746_s1 + $0x880] sm:$0xff]  ;;  %v293_v38 = vld [vmem:[%s4746_s1 + $0x888] sm:$0xff] }
  0x5b   :  { %2696 = vmatpush3.bf16.msra.mxu1 %v2695_v39  ;;  %v266_v39 = vld [vmem:[%s4746_s1 + $0x7b0] sm:$0xff] }
  0x5c   :  { %2698 = vmatprep.subr.bf16.mxu1 %v2697_v46  ;;  %v218_v46 = vld [vmem:[%s4746_s1 + $0x630] sm:$0xff]  ;;  %v2749_v49 = vpack.c.bf16 %v267_v40, %v266_v39  ;;  %v324_v39 = vld [vmem:[%s4746_s1 + $0x980] sm:$0xff]  ;;  %v325_v40 = vld [vmem:[%s4746_s1 + $0x988] sm:$0xff] }
  0x5d   :  { %2668 = vmatpush3.bf16.msra.mxu0 %v2667_v53  ;;  %v237_v53 = vld [vmem:[%s4746_s1 + $0x6c8] sm:$0xff]  ;;  %v2801_v50 = vpack.c.bf16 %v325_v40, %v324_v39  ;;  %v302_v39 = vld [vmem:[%s4746_s1 + $0x8d0] sm:$0xff]  ;;  %v303_v40 = vld [vmem:[%s4746_s1 + $0x8d8] sm:$0xff] }
  0x5e   :  { %2670 = vmatprep.subr.bf16.mxu0 %v2669_v55  ;;  %v2719_v55 = vpack.c.bf16 %v219_v47, %v218_v46  ;;  %v2721_v57 = vpack.c.bf16 %v237_v53, %v236_v51  ;;  %v2769_v46 = vpack.c.bf16 %v293_v38, %v292_v37  ;;  %v276_v47 = vld [vmem:[%s4746_s1 + $0x800] sm:$0xff]  ;;  %v309_v51 = vld [vmem:[%s4746_s1 + $0x908] sm:$0xff]  ;;  %v294_v53 = vld [vmem:[%s4746_s1 + $0x890] sm:$0xff] }
  0x5f   :  { %2700 = vmatpush3.bf16.msra.mxu1 %v2699_v54  ;;  %v269_v54 = vld [vmem:[%s4746_s1 + $0x7c8] sm:$0xff] }
  0x60   :  { %2702 = vmatprep.subr.bf16.mxu1 %v2701_v58  ;;  %v221_v58 = vld [vmem:[%s4746_s1 + $0x648] sm:$0xff]  ;;  %v2753_v60 = vpack.c.bf16 %v269_v54, %v268_v33  ;;  %v295_v33 = vld [vmem:[%s4746_s1 + $0x898] sm:$0xff] }
  0x61   :  { %2672 = vmatpush3.bf16.msra.mxu0 %v2671_v1  ;;  %v271_v1 = vld [vmem:[%s4746_s1 + $0x7d8] sm:$0xff]  ;;  %v317_v38 = vld [vmem:[%s4746_s1 + $0x948] sm:$0xff] }
  0x62   :  { %2706 = vmatprep.subr.bf16.mxu0 %v2705_v3  ;;  %v2755_v3 = vpack.c.bf16 %v253_v61, %v252_v59  ;;  %v2757_v8 = vpack.c.bf16 %v271_v1, %v270_v0  ;;  %v2773_v59 = vpack.c.bf16 %v295_v33, %v294_v53  ;;  %v279_v61 = vld [vmem:[%s4746_s1 + $0x818] sm:$0xff]  ;;  %v296_v1 = vld [vmem:[%s4746_s1 + $0x8a0] sm:$0xff] }
  0x63   :  { %2704 = vmatpush3.bf16.msra.mxu1 %v2703_v2  ;;  %v2723_v2 = vpack.c.bf16 %v221_v58, %v220_v45  ;;  %v2771_v45 = vpack.c.bf16 %v277_v48, %v276_v47  ;;  %v311_v0 = vld [vmem:[%s4746_s1 + $0x918] sm:$0xff]  ;;  %v2789_v47 = vpack.c.bf16 %v303_v40, %v302_v39  ;;  %v286_v48 = vld [vmem:[%s4746_s1 + $0x850] sm:$0xff]  ;;  %v304_v33 = vld [vmem:[%s4746_s1 + $0x8e0] sm:$0xff] }
  0x64   :  { %2738 = vmatprep.subr.bf16.mxu1 %v2737_v7  ;;  %1068 = vmatmul.mubr.f32.vlgmr.msra.gmra.mrb[4].mxu0 %v3530_v42  ;;  %v216_v42 = vld [vmem:[%s4746_s1 + $0x620] sm:$0xff]  ;;  %v254_v7 = vld [vmem:[%s4746_s1 + $0x750] sm:$0xff]  ;;  %v319_v53 = vld [vmem:[%s4746_s1 + $0x958] sm:$0xff] }
  0x65   :  { %2708 = vmatpush3.bf16.msra.mxu0 %v2707_v16  ;;  %1207 = vmatprep.mubr.f32.mxu0 %v621_v26  ;;  %v2715_v41 = vpack.c.bf16 %v217_v34, %v216_v42  ;;  %v273_v16 = vld [vmem:[%s4746_s1 + $0x7e8] sm:$0xff]  ;;  %v243_v26 = vld [vmem:[%s4746_s1 + $0x6f8] sm:$0xff]  ;;  %v226_v42 = vld [vmem:[%s4746_s1 + $0x670] sm:$0xff] }
  0x66   :  { %1138 = vmatmul.mubr.f32.vlgmr.msra.gmra.mrb[4].mxu1 %v3551_v52  ;;  %2710 = vmatprep.subr.bf16.mxu0 %v2709_v18  ;;  %v249_v52 = vld [vmem:[%s4746_s1 + $0x728] sm:$0xff]  ;;  %v2759_v18 = vpack.c.bf16 %v255_v9, %v254_v7  ;;  %v2761_v23 = vpack.c.bf16 %v273_v16, %v272_v14  ;;  %v227_v34 = vld [vmem:[%s4746_s1 + $0x678] sm:$0xff]  ;;  %v298_v16 = vld [vmem:[%s4746_s1 + $0x8b0] sm:$0xff] }
  0x67   :  { %2740 = vmatpush3.bf16.msra.mxu1 %v2739_v17  ;;  %1277 = vmatprep.mubr.f32.mxu1 %v622_v29  ;;  %v2747_v43 = vpack.c.bf16 %v249_v52, %v248_v35  ;;  %v2727_v17 = vpack.c.bf16 %v223_v6, %v222_v5  ;;  %v2731_v29 = vpack.c.bf16 %v225_v21, %v224_v20  ;;  %v258_v35 = vld [vmem:[%s4746_s1 + $0x770] sm:$0xff]  ;;  %v259_v52 = vld [vmem:[%s4746_s1 + $0x778] sm:$0xff]  ;;  %v329_v5 = vld [vmem:[%s4746_s1 + $0x9a8] sm:$0xff] }
  0x68   :  { %2742 = vmatprep.subr.bf16.mxu1 %v2741_v22  ;;  %v256_v22 = vld [vmem:[%s4746_s1 + $0x760] sm:$0xff]  ;;  %v374_v39 = vld [vmem:[%s4746_s1 + $0xb10] sm:$0xff] }
  0x69   :  { %2712 = vmatpush3.bf16.msra.mxu0 %v2711_v30  ;;  %v536_v30 = vld [vmem:[%s4747_s0 + $0x20] sm:$0xff] }
  0x6a   :  { %2714 = vmatprep.subr.bf16.mxu0 %v2713_v32  ;;  %v2733_v32 = vpack.c.bf16 %v243_v26, %v242_v25  ;;  %v3929_v54 = vrot.slane %v536_v30, %v3227_v13  ;;  %v314_v25 = vld [vmem:[%s4746_s1 + $0x930] sm:$0xff] }
  0x6b   :  { %2744 = vmatpush3.bf16.msra.mxu1 %v2743_v31  ;;  %v2763_v31 = vpack.c.bf16 %v257_v24, %v256_v22  ;;  %v283_v24 = vld [vmem:[%s4746_s1 + $0x838] sm:$0xff] }
  0x6c   :  { %2746 = vmatprep.subr.bf16.mxu1 %v2745_v36  ;;  %v2765_v36 = vpack.c.bf16 %v275_v28, %v274_v27  ;;  %v315_v27 = vld [vmem:[%s4746_s1 + $0x938] sm:$0xff]  ;;  %v300_v28 = vld [vmem:[%s4746_s1 + $0x8c0] sm:$0xff] }
  0x6d   :  { %2716 = vmatpush3.bf16.msra.mxu0 %v2715_v41  ;;  %v623_v41 = vcombine.high %v536_v30, %v536_v30  ;;  %v332_v30 = vld [vmem:[%s4746_s1 + $0x9c0] sm:$0xff] }
  0x6e   :  { %2718 = vmatprep.subr.bf16.mxu0 %v2717_v44  ;;  %v2767_v44 = vpack.c.bf16 %v259_v52, %v258_v35  ;;  %v284_v35 = vld [vmem:[%s4746_s1 + $0x840] sm:$0xff] }
  0x6f   :  { %2748 = vmatpush3.bf16.msra.mxu1 %v2747_v43  ;;  %v2735_v43 = vpack.c.bf16 %v227_v34, %v226_v42  ;;  %v2815_v42 = vpack.c.bf16 %v315_v27, %v314_v25  ;;  %v316_v52 = vld [vmem:[%s4746_s1 + $0x940] sm:$0xff]  ;;  %v341_v25 = vld [vmem:[%s4746_s1 + $0xa08] sm:$0xff] }
  0x70   :  { %2750 = vmatprep.subr.bf16.mxu1 %v2749_v49  ;;  %v308_v49 = vld [vmem:[%s4746_s1 + $0x900] sm:$0xff] }
  0x71   :  { %2720 = vmatpush3.bf16.msra.mxu0 %v2719_v55  ;;  %v326_v55 = vld [vmem:[%s4746_s1 + $0x990] sm:$0xff]  ;;  %v2803_v58 = vpack.c.bf16 %v309_v51, %v308_v49  ;;  %v287_v49 = vld [vmem:[%s4746_s1 + $0x858] sm:$0xff] }
  0x72   :  { %2722 = vmatprep.subr.bf16.mxu0 %v2721_v57  ;;  %v3938_v57 = vrot.slane %v623_v41, %v3227_v13  ;;  %v334_v41 = vld [vmem:[%s4746_s1 + $0x9d0] sm:$0xff] }
  0x73   :  { %2752 = vmatpush3.bf16.msra.mxu1 %v2751_v56  ;;  %v327_v56 = vld [vmem:[%s4746_s1 + $0x998] sm:$0xff] }
  0x74   :  { %2754 = vmatprep.subr.bf16.mxu1 %v2753_v60  ;;  %v278_v60 = vld [vmem:[%s4746_s1 + $0x810] sm:$0xff]  ;;  %v2805_v63 = vpack.c.bf16 %v327_v56, %v326_v55  ;;  %v639_v6 = vcombine.high %v3938_v57, %v3938_v57  ;;  %v305_v55 = vld [vmem:[%s4746_s1 + $0x8e8] sm:$0xff]  ;;  %v336_v56 = vld [vmem:[%s4746_s1 + $0x9e0] sm:$0xff] }
  0x75   :  { %2724 = vmatpush3.bf16.msra.mxu0 %v2723_v2  ;;  %v297_v2 = vld [vmem:[%s4746_s1 + $0x8a8] sm:$0xff]  ;;  %v2775_v7 = vpack.c.bf16 %v279_v61, %v278_v60  ;;  %v2793_v60 = vpack.c.bf16 %v305_v55, %v304_v33  ;;  %v288_v61 = vld [vmem:[%s4746_s1 + $0x860] sm:$0xff] }
  0x76   :  { %2726 = vmatprep.subr.bf16.mxu0 %v2725_v4  ;;  %v328_v4 = vld [vmem:[%s4746_s1 + $0x9a0] sm:$0xff]  ;;  %v2777_v9 = vpack.c.bf16 %v297_v2, %v296_v1  ;;  %v321_v1 = vld [vmem:[%s4746_s1 + $0x968] sm:$0xff]  ;;  %v306_v2 = vld [vmem:[%s4746_s1 + $0x8f0] sm:$0xff] }
  0x77   :  { %2756 = vmatpush3.bf16.msra.mxu1 %v2755_v3  ;;  %v638_v3 = vcombine.high %v3929_v54, %v3929_v54  ;;  %v2809_v14 = vpack.c.bf16 %v329_v5, %v328_v4  ;;  %v338_v4 = vld [vmem:[%s4746_s1 + $0x9f0] sm:$0xff]  ;;  %v339_v5 = vld [vmem:[%s4746_s1 + $0x9f8] sm:$0xff]  ;;  %v345_v33 = vld [vmem:[%s4746_s1 + $0xa28] sm:$0xff] }
  0x78   :  { %2758 = vmatprep.subr.bf16.mxu1 %v2757_v8  ;;  %v2807_v8 = vpack.c.bf16 %v311_v0, %v310_v62  ;;  %v289_v62 = vld [vmem:[%s4746_s1 + $0x868] sm:$0xff]  ;;  %v376_v55 = vld [vmem:[%s4746_s1 + $0xb20] sm:$0xff] }
  0x79   :  { %2728 = vmatpush3.bf16.msra.mxu0 %v2727_v17  ;;  %v299_v17 = vld [vmem:[%s4746_s1 + $0x8b8] sm:$0xff] }
  0x7a   :  { %2730 = vmatprep.subr.bf16.mxu0 %v2729_v19  ;;  %v331_v19 = vld [vmem:[%s4746_s1 + $0x9b8] sm:$0xff]  ;;  %v2781_v22 = vpack.c.bf16 %v299_v17, %v298_v16  ;;  %v356_v16 = vld [vmem:[%s4746_s1 + $0xa80] sm:$0xff]  ;;  %v357_v17 = vld [vmem:[%s4746_s1 + $0xa88] sm:$0xff] }
  0x7b   :  { %2760 = vmatpush3.bf16.msra.mxu1 %v2759_v18  ;;  %v330_v18 = vld [vmem:[%s4746_s1 + $0x9b0] sm:$0xff] }
  0x7c   :  { %2762 = vmatprep.subr.bf16.mxu1 %v2761_v23  ;;  %v282_v23 = vld [vmem:[%s4746_s1 + $0x830] sm:$0xff]  ;;  %v2813_v26 = vpack.c.bf16 %v331_v19, %v330_v18  ;;  %v388_v18 = vld [vmem:[%s4746_s1 + $0xb80] sm:$0xff]  ;;  %v389_v19 = vld [vmem:[%s4746_s1 + $0xb88] sm:$0xff] }
  0x7d   :  { %2732 = vmatpush3.bf16.msra.mxu0 %v2731_v29  ;;  %v301_v29 = vld [vmem:[%s4746_s1 + $0x8c8] sm:$0xff]  ;;  %v2865_v27 = vpack.c.bf16 %v389_v19, %v388_v18  ;;  %v366_v18 = vld [vmem:[%s4746_s1 + $0xad0] sm:$0xff]  ;;  %v367_v19 = vld [vmem:[%s4746_s1 + $0xad8] sm:$0xff] }
  0x7e   :  { %2734 = vmatprep.subr.bf16.mxu0 %v2733_v32  ;;  %v2783_v32 = vpack.c.bf16 %v283_v24, %v282_v23  ;;  %v2785_v34 = vpack.c.bf16 %v301_v29, %v300_v28  ;;  %v2833_v23 = vpack.c.bf16 %v357_v17, %v356_v16  ;;  %v340_v24 = vld [vmem:[%s4746_s1 + $0xa00] sm:$0xff]  ;;  %v373_v28 = vld [vmem:[%s4746_s1 + $0xb08] sm:$0xff]  ;;  %v358_v29 = vld [vmem:[%s4746_s1 + $0xa90] sm:$0xff] }
  0x7f   :  { %2764 = vmatpush3.bf16.msra.mxu1 %v2763_v31  ;;  %v333_v31 = vld [vmem:[%s4746_s1 + $0x9c8] sm:$0xff] }
  0x80   :  { %2766 = vmatprep.subr.bf16.mxu1 %v2765_v36  ;;  %v285_v36 = vld [vmem:[%s4746_s1 + $0x848] sm:$0xff]  ;;  %v2817_v37 = vpack.c.bf16 %v333_v31, %v332_v30  ;;  %v359_v30 = vld [vmem:[%s4746_s1 + $0xa98] sm:$0xff] }
  0x81   :  { %2736 = vmatpush3.bf16.msra.mxu0 %v2735_v43  ;;  %v335_v43 = vld [vmem:[%s4746_s1 + $0x9d8] sm:$0xff]  ;;  %v381_v17 = vld [vmem:[%s4746_s1 + $0xb48] sm:$0xff] }
  0x82   :  { %2770 = vmatprep.subr.bf16.mxu0 %v2769_v46  ;;  %v2819_v46 = vpack.c.bf16 %v317_v38, %v316_v52  ;;  %v2821_v51 = vpack.c.bf16 %v335_v43, %v334_v41  ;;  %v2837_v52 = vpack.c.bf16 %v359_v30, %v358_v29  ;;  %v343_v38 = vld [vmem:[%s4746_s1 + $0xa18] sm:$0xff]  ;;  %v360_v43 = vld [vmem:[%s4746_s1 + $0xaa0] sm:$0xff] }
  0x83   :  { %2768 = vmatpush3.bf16.msra.mxu1 %v2767_v44  ;;  %v2787_v44 = vpack.c.bf16 %v285_v36, %v284_v35  ;;  %v2835_v35 = vpack.c.bf16 %v341_v25, %v340_v24  ;;  %v375_v41 = vld [vmem:[%s4746_s1 + $0xb18] sm:$0xff]  ;;  %v2853_v24 = vpack.c.bf16 %v367_v19, %v366_v18  ;;  %v350_v25 = vld [vmem:[%s4746_s1 + $0xa50] sm:$0xff]  ;;  %v368_v30 = vld [vmem:[%s4746_s1 + $0xae0] sm:$0xff] }
  0x84   :  { %2802 = vmatprep.subr.bf16.mxu1 %v2801_v50  ;;  %1208 = vmatmul.mubr.f32.vlgmr.msra.gmra.mrb[6].mxu0 %v3722_v11  ;;  %v280_v11 = vld [vmem:[%s4746_s1 + $0x820] sm:$0xff]  ;;  %v318_v50 = vld [vmem:[%s4746_s1 + $0x950] sm:$0xff]  ;;  %v383_v29 = vld [vmem:[%s4746_s1 + $0xb58] sm:$0xff] }
  0x85   :  { %2772 = vmatpush3.bf16.msra.mxu0 %v2771_v45  ;;  %1347 = vmatprep.mubr.f32.mxu0 %v638_v3  ;;  %v2779_v20 = vpack.c.bf16 %v281_v10, %v280_v11  ;;  %v337_v45 = vld [vmem:[%s4746_s1 + $0x9e8] sm:$0xff]  ;;  %v307_v3 = vld [vmem:[%s4746_s1 + $0x8f8] sm:$0xff]  ;;  %v290_v11 = vld [vmem:[%s4746_s1 + $0x870] sm:$0xff] }
  0x86   :  { %1278 = vmatmul.mubr.f32.vlgmr.msra.gmra.mrb[6].mxu1 %v3731_v15  ;;  %2774 = vmatprep.subr.bf16.mxu0 %v2773_v59  ;;  %v313_v15 = vld [vmem:[%s4746_s1 + $0x928] sm:$0xff]  ;;  %v2823_v59 = vpack.c.bf16 %v319_v53, %v318_v50  ;;  %v2825_v0 = vpack.c.bf16 %v337_v45, %v336_v56  ;;  %v291_v10 = vld [vmem:[%s4746_s1 + $0x878] sm:$0xff]  ;;  %v362_v45 = vld [vmem:[%s4746_s1 + $0xab0] sm:$0xff] }
  0x87   :  { %2804 = vmatpush3.bf16.msra.mxu1 %v2803_v58  ;;  %1417 = vmatprep.mubr.f32.mxu1 %v639_v6  ;;  %v2811_v21 = vpack.c.bf16 %v313_v15, %v312_v12  ;;  %v2791_v58 = vpack.c.bf16 %v287_v49, %v286_v48  ;;  %v2795_v6 = vpack.c.bf16 %v289_v62, %v288_v61  ;;  %v322_v12 = vld [vmem:[%s4746_s1 + $0x970] sm:$0xff]  ;;  %v323_v15 = vld [vmem:[%s4746_s1 + $0x978] sm:$0xff]  ;;  %v393_v48 = vld [vmem:[%s4746_s1 + $0xba8] sm:$0xff] }
  0x88   :  { %2806 = vmatprep.subr.bf16.mxu1 %v2805_v63  ;;  %v320_v63 = vld [vmem:[%s4746_s1 + $0x960] sm:$0xff]  ;;  %v438_v18 = vld [vmem:[%s4746_s1 + $0xd10] sm:$0xff] }
  0x89   :  { %2776 = vmatpush3.bf16.msra.mxu0 %v2775_v7  ;;  %v537_v7 = vld [vmem:[%s4747_s0 + $0x28] sm:$0xff] }
  0x8a   :  { %2778 = vmatprep.subr.bf16.mxu0 %v2777_v9  ;;  %v2797_v9 = vpack.c.bf16 %v307_v3, %v306_v2  ;;  %v4136_v31 = vrot.slane %v537_v7, %v3227_v13  ;;  %v378_v2 = vld [vmem:[%s4746_s1 + $0xb30] sm:$0xff] }
  0x8b   :  { %2808 = vmatpush3.bf16.msra.mxu1 %v2807_v8  ;;  %v2827_v8 = vpack.c.bf16 %v321_v1, %v320_v63  ;;  %v347_v1 = vld [vmem:[%s4746_s1 + $0xa38] sm:$0xff] }
  0x8c   :  { %2810 = vmatprep.subr.bf16.mxu1 %v2809_v14  ;;  %v2829_v14 = vpack.c.bf16 %v339_v5, %v338_v4  ;;  %v379_v4 = vld [vmem:[%s4746_s1 + $0xb38] sm:$0xff]  ;;  %v364_v5 = vld [vmem:[%s4746_s1 + $0xac0] sm:$0xff] }
  0x8d   :  { %2780 = vmatpush3.bf16.msra.mxu0 %v2779_v20  ;;  %v640_v20 = vcombine.high %v537_v7, %v537_v7  ;;  %v396_v7 = vld [vmem:[%s4746_s1 + $0xbc0] sm:$0xff] }
  0x8e   :  { %2782 = vmatprep.subr.bf16.mxu0 %v2781_v22  ;;  %v2831_v22 = vpack.c.bf16 %v323_v15, %v322_v12  ;;  %v348_v12 = vld [vmem:[%s4746_s1 + $0xa40] sm:$0xff] }
  0x8f   :  { %2812 = vmatpush3.bf16.msra.mxu1 %v2811_v21  ;;  %v2799_v21 = vpack.c.bf16 %v291_v10, %v290_v11  ;;  %v2879_v11 = vpack.c.bf16 %v379_v4, %v378_v2  ;;  %v380_v15 = vld [vmem:[%s4746_s1 + $0xb40] sm:$0xff]  ;;  %v405_v2 = vld [vmem:[%s4746_s1 + $0xc08] sm:$0xff] }
  0x90   :  { %2814 = vmatprep.subr.bf16.mxu1 %v2813_v26  ;;  %v372_v26 = vld [vmem:[%s4746_s1 + $0xb00] sm:$0xff] }
  0x91   :  { %2784 = vmatpush3.bf16.msra.mxu0 %v2783_v32  ;;  %v390_v32 = vld [vmem:[%s4746_s1 + $0xb90] sm:$0xff]  ;;  %v2867_v36 = vpack.c.bf16 %v373_v28, %v372_v26  ;;  %v351_v26 = vld [vmem:[%s4746_s1 + $0xa58] sm:$0xff] }
  0x92   :  { %2786 = vmatprep.subr.bf16.mxu0 %v2785_v34  ;;  %v4145_v34 = vrot.slane %v640_v20, %v3227_v13  ;;  %v398_v20 = vld [vmem:[%s4746_s1 + $0xbd0] sm:$0xff] }
  0x93   :  { %2816 = vmatpush3.bf16.msra.mxu1 %v2815_v42  ;;  %v391_v42 = vld [vmem:[%s4746_s1 + $0xb98] sm:$0xff] }
  0x94   :  { %2818 = vmatprep.subr.bf16.mxu1 %v2817_v37  ;;  %v342_v37 = vld [vmem:[%s4746_s1 + $0xa10] sm:$0xff]  ;;  %v2869_v40 = vpack.c.bf16 %v391_v42, %v390_v32  ;;  %v656_v49 = vcombine.high %v4145_v34, %v4145_v34  ;;  %v369_v32 = vld [vmem:[%s4746_s1 + $0xae8] sm:$0xff]  ;;  %v400_v42 = vld [vmem:[%s4746_s1 + $0xbe0] sm:$0xff] }
  0x95   :  { %2788 = vmatpush3.bf16.msra.mxu0 %v2787_v44  ;;  %v361_v44 = vld [vmem:[%s4746_s1 + $0xaa8] sm:$0xff]  ;;  %v2839_v50 = vpack.c.bf16 %v343_v38, %v342_v37  ;;  %v2857_v37 = vpack.c.bf16 %v369_v32, %v368_v30  ;;  %v352_v38 = vld [vmem:[%s4746_s1 + $0xa60] sm:$0xff] }
  0x96   :  { %2790 = vmatprep.subr.bf16.mxu0 %v2789_v47  ;;  %v392_v47 = vld [vmem:[%s4746_s1 + $0xba0] sm:$0xff]  ;;  %v2841_v53 = vpack.c.bf16 %v361_v44, %v360_v43  ;;  %v385_v43 = vld [vmem:[%s4746_s1 + $0xb68] sm:$0xff]  ;;  %v370_v44 = vld [vmem:[%s4746_s1 + $0xaf0] sm:$0xff] }
  0x97   :  { %2820 = vmatpush3.bf16.msra.mxu1 %v2819_v46  ;;  %v655_v46 = vcombine.high %v4136_v31, %v4136_v31  ;;  %v2873_v56 = vpack.c.bf16 %v393_v48, %v392_v47  ;;  %v402_v47 = vld [vmem:[%s4746_s1 + $0xbf0] sm:$0xff]  ;;  %v403_v48 = vld [vmem:[%s4746_s1 + $0xbf8] sm:$0xff]  ;;  %v409_v30 = vld [vmem:[%s4746_s1 + $0xc28] sm:$0xff] }
  0x98   :  { %2822 = vmatprep.subr.bf16.mxu1 %v2821_v51  ;;  %v2871_v51 = vpack.c.bf16 %v375_v41, %v374_v39  ;;  %v353_v39 = vld [vmem:[%s4746_s1 + $0xa68] sm:$0xff]  ;;  %v440_v32 = vld [vmem:[%s4746_s1 + $0xd20] sm:$0xff] }
  0x99   :  { %2792 = vmatpush3.bf16.msra.mxu0 %v2791_v58  ;;  %v363_v58 = vld [vmem:[%s4746_s1 + $0xab8] sm:$0xff] }
  0x9a   :  { %2794 = vmatprep.subr.bf16.mxu0 %v2793_v60  ;;  %v395_v60 = vld [vmem:[%s4746_s1 + $0xbb8] sm:$0xff]  ;;  %v2845_v63 = vpack.c.bf16 %v363_v58, %v362_v45  ;;  %v420_v45 = vld [vmem:[%s4746_s1 + $0xc80] sm:$0xff]  ;;  %v421_v58 = vld [vmem:[%s4746_s1 + $0xc88] sm:$0xff] }
  0x9b   :  { %2824 = vmatpush3.bf16.msra.mxu1 %v2823_v59  ;;  %v394_v59 = vld [vmem:[%s4746_s1 + $0xbb0] sm:$0xff] }
  0x9c   :  { %2826 = vmatprep.subr.bf16.mxu1 %v2825_v0  ;;  %v346_v0 = vld [vmem:[%s4746_s1 + $0xa30] sm:$0xff]  ;;  %v2877_v3 = vpack.c.bf16 %v395_v60, %v394_v59  ;;  %v452_v59 = vld [vmem:[%s4746_s1 + $0xd80] sm:$0xff]  ;;  %v453_v60 = vld [vmem:[%s4746_s1 + $0xd88] sm:$0xff] }
  0x9d   :  { %2796 = vmatpush3.bf16.msra.mxu0 %v2795_v6  ;;  %v365_v6 = vld [vmem:[%s4746_s1 + $0xac8] sm:$0xff]  ;;  %v2929_v4 = vpack.c.bf16 %v453_v60, %v452_v59  ;;  %v430_v59 = vld [vmem:[%s4746_s1 + $0xcd0] sm:$0xff]  ;;  %v431_v60 = vld [vmem:[%s4746_s1 + $0xcd8] sm:$0xff] }
  0x9e   :  { %2798 = vmatprep.subr.bf16.mxu0 %v2797_v9  ;;  %v2847_v9 = vpack.c.bf16 %v347_v1, %v346_v0  ;;  %v2849_v10 = vpack.c.bf16 %v365_v6, %v364_v5  ;;  %v2897_v0 = vpack.c.bf16 %v421_v58, %v420_v45  ;;  %v404_v1 = vld [vmem:[%s4746_s1 + $0xc00] sm:$0xff]  ;;  %v437_v5 = vld [vmem:[%s4746_s1 + $0xd08] sm:$0xff]  ;;  %v422_v6 = vld [vmem:[%s4746_s1 + $0xc90] sm:$0xff] }
  0x9f   :  { %2828 = vmatpush3.bf16.msra.mxu1 %v2827_v8  ;;  %v397_v8 = vld [vmem:[%s4746_s1 + $0xbc8] sm:$0xff] }
  0xa0   :  { %2830 = vmatprep.subr.bf16.mxu1 %v2829_v14  ;;  %v349_v14 = vld [vmem:[%s4746_s1 + $0xa48] sm:$0xff]  ;;  %v2881_v16 = vpack.c.bf16 %v397_v8, %v396_v7  ;;  %v423_v7 = vld [vmem:[%s4746_s1 + $0xc98] sm:$0xff] }
  0xa1   :  { %2800 = vmatpush3.bf16.msra.mxu0 %v2799_v21  ;;  %v399_v21 = vld [vmem:[%s4746_s1 + $0xbd8] sm:$0xff]  ;;  %v445_v58 = vld [vmem:[%s4746_s1 + $0xd48] sm:$0xff] }
  0xa2   :  { %2834 = vmatprep.subr.bf16.mxu0 %v2833_v23  ;;  %v2883_v23 = vpack.c.bf16 %v381_v17, %v380_v15  ;;  %v2885_v28 = vpack.c.bf16 %v399_v21, %v398_v20  ;;  %v2901_v15 = vpack.c.bf16 %v423_v7, %v422_v6  ;;  %v407_v17 = vld [vmem:[%s4746_s1 + $0xc18] sm:$0xff]  ;;  %v424_v21 = vld [vmem:[%s4746_s1 + $0xca0] sm:$0xff] }
  0xa3   :  { %2832 = vmatpush3.bf16.msra.mxu1 %v2831_v22  ;;  %v2851_v22 = vpack.c.bf16 %v349_v14, %v348_v12  ;;  %v2899_v12 = vpack.c.bf16 %v405_v2, %v404_v1  ;;  %v439_v20 = vld [vmem:[%s4746_s1 + $0xd18] sm:$0xff]  ;;  %v2917_v1 = vpack.c.bf16 %v431_v60, %v430_v59  ;;  %v414_v2 = vld [vmem:[%s4746_s1 + $0xc50] sm:$0xff]  ;;  %v432_v7 = vld [vmem:[%s4746_s1 + $0xce0] sm:$0xff] }
  0xa4   :  { %2866 = vmatprep.subr.bf16.mxu1 %v2865_v27  ;;  %1348 = vmatmul.mubr.f32.vlgmr.msra.gmra.mrb[8].mxu0 %v3929_v54  ;;  %v344_v54 = vld [vmem:[%s4746_s1 + $0xa20] sm:$0xff]  ;;  %v382_v27 = vld [vmem:[%s4746_s1 + $0xb50] sm:$0xff]  ;;  %v447_v6 = vld [vmem:[%s4746_s1 + $0xd58] sm:$0xff] }
  0xa5   :  { %2836 = vmatpush3.bf16.msra.mxu0 %v2835_v35  ;;  %1487 = vmatprep.mubr.f32.mxu0 %v655_v46  ;;  %v2843_v61 = vpack.c.bf16 %v345_v33, %v344_v54  ;;  %v401_v35 = vld [vmem:[%s4746_s1 + $0xbe8] sm:$0xff]  ;;  %v371_v46 = vld [vmem:[%s4746_s1 + $0xaf8] sm:$0xff]  ;;  %v354_v54 = vld [vmem:[%s4746_s1 + $0xa70] sm:$0xff] }
  0xa6   :  { %1418 = vmatmul.mubr.f32.vlgmr.msra.gmra.mrb[8].mxu1 %v3938_v57  ;;  %2838 = vmatprep.subr.bf16.mxu0 %v2837_v52  ;;  %v377_v57 = vld [vmem:[%s4746_s1 + $0xb28] sm:$0xff]  ;;  %v2887_v52 = vpack.c.bf16 %v383_v29, %v382_v27  ;;  %v2889_v41 = vpack.c.bf16 %v401_v35, %v400_v42  ;;  %v355_v33 = vld [vmem:[%s4746_s1 + $0xa78] sm:$0xff]  ;;  %v426_v35 = vld [vmem:[%s4746_s1 + $0xcb0] sm:$0xff] }
  0xa7   :  { %2868 = vmatpush3.bf16.msra.mxu1 %v2867_v36  ;;  %1557 = vmatprep.mubr.f32.mxu1 %v656_v49  ;;  %v2875_v62 = vpack.c.bf16 %v377_v57, %v376_v55  ;;  %v2855_v36 = vpack.c.bf16 %v351_v26, %v350_v25  ;;  %v2859_v49 = vpack.c.bf16 %v353_v39, %v352_v38  ;;  %v386_v55 = vld [vmem:[%s4746_s1 + $0xb70] sm:$0xff]  ;;  %v387_v57 = vld [vmem:[%s4746_s1 + $0xb78] sm:$0xff]  ;;  %v457_v25 = vld [vmem:[%s4746_s1 + $0xda8] sm:$0xff] }
  0xa8   :  { %2870 = vmatprep.subr.bf16.mxu1 %v2869_v40  ;;  %v384_v40 = vld [vmem:[%s4746_s1 + $0xb60] sm:$0xff]  ;;  %v502_v59 = vld [vmem:[%s4746_s1 + $0xf10] sm:$0xff]  ;;  %v503_v60 = vld [vmem:[%s4746_s1 + $0xf18] sm:$0xff] }
  0xa9   :  { %2840 = vmatpush3.bf16.msra.mxu0 %v2839_v50  ;;  %v538_v50 = vld [vmem:[%s4747_s0 + $0x30] sm:$0xff] }
  0xaa   :  { %2842 = vmatprep.subr.bf16.mxu0 %v2841_v53  ;;  %v2861_v53 = vpack.c.bf16 %v371_v46, %v370_v44  ;;  %v4343_v8 = vrot.slane %v538_v50, %v3227_v13  ;;  %v442_v44 = vld [vmem:[%s4746_s1 + $0xd30] sm:$0xff] }
  0xab   :  { %2872 = vmatpush3.bf16.msra.mxu1 %v2871_v51  ;;  %v2891_v51 = vpack.c.bf16 %v385_v43, %v384_v40  ;;  %v411_v43 = vld [vmem:[%s4746_s1 + $0xc38] sm:$0xff] }
  0xac   :  { %2874 = vmatprep.subr.bf16.mxu1 %v2873_v56  ;;  %v2893_v56 = vpack.c.bf16 %v403_v48, %v402_v47  ;;  %v443_v47 = vld [vmem:[%s4746_s1 + $0xd38] sm:$0xff]  ;;  %v428_v48 = vld [vmem:[%s4746_s1 + $0xcc0] sm:$0xff] }
  0xad   :  { %2844 = vmatpush3.bf16.msra.mxu0 %v2843_v61  ;;  %v657_v61 = vcombine.high %v538_v50, %v538_v50  ;;  %v460_v50 = vld [vmem:[%s4746_s1 + $0xdc0] sm:$0xff] }
  0xae   :  { %2846 = vmatprep.subr.bf16.mxu0 %v2845_v63  ;;  %v2895_v63 = vpack.c.bf16 %v387_v57, %v386_v55  ;;  %v412_v55 = vld [vmem:[%s4746_s1 + $0xc40] sm:$0xff] }
  0xaf   :  { %2876 = vmatpush3.bf16.msra.mxu1 %v2875_v62  ;;  %v2863_v62 = vpack.c.bf16 %v355_v33, %v354_v54  ;;  %v2943_v54 = vpack.c.bf16 %v443_v47, %v442_v44  ;;  %v444_v57 = vld [vmem:[%s4746_s1 + $0xd40] sm:$0xff]  ;;  %v469_v44 = vld [vmem:[%s4746_s1 + $0xe08] sm:$0xff] }
  0xb0   :  { %2878 = vmatprep.subr.bf16.mxu1 %v2877_v3  ;;  %v436_v3 = vld [vmem:[%s4746_s1 + $0xd00] sm:$0xff] }
  0xb1   :  { %2848 = vmatpush3.bf16.msra.mxu0 %v2847_v9  ;;  %v454_v9 = vld [vmem:[%s4746_s1 + $0xd90] sm:$0xff]  ;;  %v2931_v14 = vpack.c.bf16 %v437_v5, %v436_v3  ;;  %v415_v3 = vld [vmem:[%s4746_s1 + $0xc58] sm:$0xff] }
  0xb2   :  { %2850 = vmatprep.subr.bf16.mxu0 %v2849_v10  ;;  %v4352_v10 = vrot.slane %v657_v61, %v3227_v13  ;;  %v462_v61 = vld [vmem:[%s4746_s1 + $0xdd0] sm:$0xff] }
  0xb3   :  { %2880 = vmatpush3.bf16.msra.mxu1 %v2879_v11  ;;  %v455_v11 = vld [vmem:[%s4746_s1 + $0xd98] sm:$0xff] }
  0xb4   :  { %2882 = vmatprep.subr.bf16.mxu1 %v2881_v16  ;;  %v406_v16 = vld [vmem:[%s4746_s1 + $0xc10] sm:$0xff]  ;;  %v2933_v19 = vpack.c.bf16 %v455_v11, %v454_v9  ;;  %v673_v26 = vcombine.high %v4352_v10, %v4352_v10  ;;  %v433_v9 = vld [vmem:[%s4746_s1 + $0xce8] sm:$0xff]  ;;  %v464_v11 = vld [vmem:[%s4746_s1 + $0xde0] sm:$0xff] }
  0xb5   :  { %2852 = vmatpush3.bf16.msra.mxu0 %v2851_v22  ;;  %v425_v22 = vld [vmem:[%s4746_s1 + $0xca8] sm:$0xff]  ;;  %v2903_v27 = vpack.c.bf16 %v407_v17, %v406_v16  ;;  %v2921_v16 = vpack.c.bf16 %v433_v9, %v432_v7  ;;  %v416_v17 = vld [vmem:[%s4746_s1 + $0xc60] sm:$0xff] }
  0xb6   :  { %2854 = vmatprep.subr.bf16.mxu0 %v2853_v24  ;;  %v456_v24 = vld [vmem:[%s4746_s1 + $0xda0] sm:$0xff]  ;;  %v2905_v29 = vpack.c.bf16 %v425_v22, %v424_v21  ;;  %v449_v21 = vld [vmem:[%s4746_s1 + $0xd68] sm:$0xff]  ;;  %v434_v22 = vld [vmem:[%s4746_s1 + $0xcf0] sm:$0xff] }
  0xb7   :  { %2884 = vmatpush3.bf16.msra.mxu1 %v2883_v23  ;;  %v672_v23 = vcombine.high %v4343_v8, %v4343_v8  ;;  %v2937_v42 = vpack.c.bf16 %v457_v25, %v456_v24  ;;  %v466_v24 = vld [vmem:[%s4746_s1 + $0xdf0] sm:$0xff]  ;;  %v467_v25 = vld [vmem:[%s4746_s1 + $0xdf8] sm:$0xff]  ;;  %v504_v7 = vld [vmem:[%s4746_s1 + $0xf20] sm:$0xff] }
  0xb8   :  { %2886 = vmatprep.subr.bf16.mxu1 %v2885_v28  ;;  %v2935_v28 = vpack.c.bf16 %v439_v20, %v438_v18  ;;  %v417_v18 = vld [vmem:[%s4746_s1 + $0xc68] sm:$0xff] }
  0xb9   :  { %2856 = vmatpush3.bf16.msra.mxu0 %v2855_v36  ;;  %v427_v36 = vld [vmem:[%s4746_s1 + $0xcb8] sm:$0xff] }
  0xba   :  { %2858 = vmatprep.subr.bf16.mxu0 %v2857_v37  ;;  %v459_v37 = vld [vmem:[%s4746_s1 + $0xdb8] sm:$0xff]  ;;  %v2909_v40 = vpack.c.bf16 %v427_v36, %v426_v35  ;;  %v484_v35 = vld [vmem:[%s4746_s1 + $0xe80] sm:$0xff]  ;;  %v485_v36 = vld [vmem:[%s4746_s1 + $0xe88] sm:$0xff] }
  0xbb   :  { %2888 = vmatpush3.bf16.msra.mxu1 %v2887_v52  ;;  %v458_v52 = vld [vmem:[%s4746_s1 + $0xdb0] sm:$0xff] }
  0xbc   :  { %2890 = vmatprep.subr.bf16.mxu1 %v2889_v41  ;;  %v410_v41 = vld [vmem:[%s4746_s1 + $0xc30] sm:$0xff]  ;;  %v2941_v46 = vpack.c.bf16 %v459_v37, %v458_v52  ;;  %v516_v52 = vld [vmem:[%s4746_s1 + $0xf80] sm:$0xff]  ;;  %v517_v37 = vld [vmem:[%s4746_s1 + $0xf88] sm:$0xff] }
  0xbd   :  { %2860 = vmatpush3.bf16.msra.mxu0 %v2859_v49  ;;  %v429_v49 = vld [vmem:[%s4746_s1 + $0xcc8] sm:$0xff]  ;;  %v2993_v47 = vpack.c.bf16 %v517_v37, %v516_v52  ;;  %v495_v52 = vld [vmem:[%s4746_s1 + $0xed8] sm:$0xff]  ;;  %v526_v37 = vld [vmem:[%s4746_s1 + $0xfd0] sm:$0xff] }
  0xbe   :  { %2862 = vmatprep.subr.bf16.mxu0 %v2861_v53  ;;  %v2911_v53 = vpack.c.bf16 %v411_v43, %v410_v41  ;;  %v2913_v33 = vpack.c.bf16 %v429_v49, %v428_v48  ;;  %v2961_v41 = vpack.c.bf16 %v485_v36, %v484_v35  ;;  %v468_v43 = vld [vmem:[%s4746_s1 + $0xe00] sm:$0xff]  ;;  %v501_v48 = vld [vmem:[%s4746_s1 + $0xf08] sm:$0xff]  ;;  %v486_v49 = vld [vmem:[%s4746_s1 + $0xe90] sm:$0xff] }
  0xbf   :  { %2892 = vmatpush3.bf16.msra.mxu1 %v2891_v51  ;;  %v461_v51 = vld [vmem:[%s4746_s1 + $0xdc8] sm:$0xff]  ;;  %v494_v36 = vld [vmem:[%s4746_s1 + $0xed0] sm:$0xff] }
  0xc0   :  { %2894 = vmatprep.subr.bf16.mxu1 %v2893_v56  ;;  %v413_v56 = vld [vmem:[%s4746_s1 + $0xc48] sm:$0xff]  ;;  %v2945_v45 = vpack.c.bf16 %v461_v51, %v460_v50  ;;  %v487_v50 = vld [vmem:[%s4746_s1 + $0xe98] sm:$0xff] }
  0xc1   :  { %2864 = vmatpush3.bf16.msra.mxu0 %v2863_v62  ;;  %v463_v62 = vld [vmem:[%s4746_s1 + $0xdd8] sm:$0xff]  ;;  %v509_v35 = vld [vmem:[%s4746_s1 + $0xf48] sm:$0xff] }
  0xc2   :  { %2898 = vmatprep.subr.bf16.mxu0 %v2897_v0  ;;  %v2947_v0 = vpack.c.bf16 %v445_v58, %v444_v57  ;;  %v2949_v5 = vpack.c.bf16 %v463_v62, %v462_v61  ;;  %v2965_v57 = vpack.c.bf16 %v487_v50, %v486_v49  ;;  %v471_v58 = vld [vmem:[%s4746_s1 + $0xe18] sm:$0xff]  ;;  %v488_v61 = vld [vmem:[%s4746_s1 + $0xea0] sm:$0xff]  ;;  %v489_v62 = vld [vmem:[%s4746_s1 + $0xea8] sm:$0xff] }
  0xc3   :  { %2896 = vmatpush3.bf16.msra.mxu1 %v2895_v63  ;;  %v2915_v63 = vpack.c.bf16 %v413_v56, %v412_v55  ;;  %v2963_v55 = vpack.c.bf16 %v469_v44, %v468_v43  ;;  %v478_v43 = vld [vmem:[%s4746_s1 + $0xe50] sm:$0xff]  ;;  %v479_v44 = vld [vmem:[%s4746_s1 + $0xe58] sm:$0xff]  ;;  %v496_v49 = vld [vmem:[%s4746_s1 + $0xee0] sm:$0xff] }
  0xc4   :  { %2930 = vmatprep.subr.bf16.mxu1 %v2929_v4  ;;  %1488 = vmatmul.mubr.f32.vlgmr.msra.gmra.mrb[10].mxu0 %v4136_v31  ;;  %v408_v31 = vld [vmem:[%s4746_s1 + $0xc20] sm:$0xff]  ;;  %v446_v4 = vld [vmem:[%s4746_s1 + $0xd50] sm:$0xff]  ;;  %v497_v50 = vld [vmem:[%s4746_s1 + $0xee8] sm:$0xff] }
  0xc5   :  { %2900 = vmatpush3.bf16.msra.mxu0 %v2899_v12  ;;  %1627 = vmatprep.mubr.f32.mxu0 %v672_v23  ;;  %v2907_v38 = vpack.c.bf16 %v409_v30, %v408_v31  ;;  %v465_v12 = vld [vmem:[%s4746_s1 + $0xde8] sm:$0xff]  ;;  %v435_v23 = vld [vmem:[%s4746_s1 + $0xcf8] sm:$0xff]  ;;  %v418_v31 = vld [vmem:[%s4746_s1 + $0xc70] sm:$0xff] }
  0xc6   :  { %1558 = vmatmul.mubr.f32.vlgmr.msra.gmra.mrb[10].mxu1 %v4145_v34  ;;  %2902 = vmatprep.subr.bf16.mxu0 %v2901_v15  ;;  %v441_v34 = vld [vmem:[%s4746_s1 + $0xd28] sm:$0xff]  ;;  %v2951_v15 = vpack.c.bf16 %v447_v6, %v446_v4  ;;  %v2953_v20 = vpack.c.bf16 %v465_v12, %v464_v11  ;;  %v419_v30 = vld [vmem:[%s4746_s1 + $0xc78] sm:$0xff]  ;;  %v2999_v4 = vpack.c.bf16 %v503_v60, %v502_v59  ;;  %v490_v11 = vld [vmem:[%s4746_s1 + $0xeb0] sm:$0xff] }
  0xc7   :  { %2932 = vmatpush3.bf16.msra.mxu1 %v2931_v14  ;;  %1697 = vmatprep.mubr.f32.mxu1 %v673_v26  ;;  %v2939_v39 = vpack.c.bf16 %v441_v34, %v440_v32  ;;  %v2919_v14 = vpack.c.bf16 %v415_v3, %v414_v2  ;;  %v2923_v26 = vpack.c.bf16 %v417_v18, %v416_v17  ;;  %v450_v32 = vld [vmem:[%s4746_s1 + $0xd70] sm:$0xff]  ;;  %v451_v34 = vld [vmem:[%s4746_s1 + $0xd78] sm:$0xff]  ;;  %v473_v6 = vld [vmem:[%s4746_s1 + $0xe28] sm:$0xff] }
  0xc8   :  { %2934 = vmatprep.subr.bf16.mxu1 %v2933_v19  ;;  %v448_v19 = vld [vmem:[%s4746_s1 + $0xd60] sm:$0xff]  ;;  %v491_v12 = vld [vmem:[%s4746_s1 + $0xeb8] sm:$0xff] }
  0xc9   :  { %2904 = vmatpush3.bf16.msra.mxu0 %v2903_v27  ;;  %v539_v27 = vld [vmem:[%s4747_s0 + $0x38] sm:$0xff]  ;;  %v2973_v18 = vpack.c.bf16 %v491_v12, %v490_v11  ;;  %v512_v59 = vld [vmem:[%s4746_s1 + $0xf60] sm:$0xff]  ;;  %v482_v11 = vld [vmem:[%s4746_s1 + $0xe70] sm:$0xff] }
  0xca   :  { %2906 = vmatprep.subr.bf16.mxu0 %v2905_v29  ;;  %v2925_v29 = vpack.c.bf16 %v435_v23, %v434_v22  ;;  %v4550_v51 = vrot.slane %v539_v27, %v3227_v13  ;;  %v507_v23 = vld [vmem:[%s4746_s1 + $0xf38] sm:$0xff] }
  0xcb   :  { %2936 = vmatpush3.bf16.msra.mxu1 %v2935_v28  ;;  %v2955_v28 = vpack.c.bf16 %v449_v21, %v448_v19  ;;  %v474_v19 = vld [vmem:[%s4746_s1 + $0xe30] sm:$0xff]  ;;  %v483_v12 = vld [vmem:[%s4746_s1 + $0xe78] sm:$0xff] }
  0xcc   :  { %2938 = vmatprep.subr.bf16.mxu1 %v2937_v42  ;;  %v2957_v42 = vpack.c.bf16 %v467_v25, %v466_v24  ;;  %v506_v21 = vld [vmem:[%s4746_s1 + $0xf30] sm:$0xff]  ;;  %v492_v24 = vld [vmem:[%s4746_s1 + $0xec0] sm:$0xff]  ;;  %v493_v25 = vld [vmem:[%s4746_s1 + $0xec8] sm:$0xff] }
  0xcd   :  { %2908 = vmatpush3.bf16.msra.mxu0 %v2907_v38  ;;  %v674_v38 = vcombine.high %v539_v27, %v539_v27  ;;  %v525_v27 = vld [vmem:[%s4746_s1 + $0xfc8] sm:$0xff] }
  0xce   :  { %2910 = vmatprep.subr.bf16.mxu0 %v2909_v40  ;;  %v2959_v40 = vpack.c.bf16 %v451_v34, %v450_v32  ;;  %v477_v32 = vld [vmem:[%s4746_s1 + $0xe48] sm:$0xff] }
  0xcf   :  { %2940 = vmatpush3.bf16.msra.mxu1 %v2939_v39  ;;  %v2927_v39 = vpack.c.bf16 %v419_v30, %v418_v31  ;;  %v2977_v31 = vpack.c.bf16 %v493_v25, %v492_v24  ;;  %v476_v30 = vld [vmem:[%s4746_s1 + $0xe40] sm:$0xff] }
  0xd0   :  { %2942 = vmatprep.subr.bf16.mxu1 %v2941_v46  ;;  %v500_v46 = vld [vmem:[%s4746_s1 + $0xf00] sm:$0xff] }
  0xd1   :  { %2912 = vmatpush3.bf16.msra.mxu0 %v2911_v53  ;;  %v518_v53 = vld [vmem:[%s4746_s1 + $0xf90] sm:$0xff]  ;;  %v2995_v56 = vpack.c.bf16 %v501_v48, %v500_v46  ;;  %v511_v48 = vld [vmem:[%s4746_s1 + $0xf58] sm:$0xff] }
  0xd2   :  { %2914 = vmatprep.subr.bf16.mxu0 %v2913_v33  ;;  %v4559_v33 = vrot.slane %v674_v38, %v3227_v13  ;;  %v527_v38 = vld [vmem:[%s4746_s1 + $0xfd8] sm:$0xff]  ;;  %v510_v46 = vld [vmem:[%s4746_s1 + $0xf50] sm:$0xff] }
  0xd3   :  { %2944 = vmatpush3.bf16.msra.mxu1 %v2943_v54  ;;  %v519_v54 = vld [vmem:[%s4746_s1 + $0xf98] sm:$0xff] }
  0xd4   :  { %2946 = vmatprep.subr.bf16.mxu1 %v2945_v45  ;;  %v470_v45 = vld [vmem:[%s4746_s1 + $0xe10] sm:$0xff]  ;;  %v2997_v13 = vpack.c.bf16 %v519_v54, %v518_v53  ;;  %v690_v2 = vcombine.high %v4559_v33, %v4559_v33  ;;  %v528_v53 = vld [vmem:[%s4746_s1 + $0xfe0] sm:$0xff]  ;;  %v529_v54 = vld [vmem:[%s4746_s1 + $0xfe8] sm:$0xff] }
  0xd5   :  { %2916 = vmatpush3.bf16.msra.mxu0 %v2915_v63  ;;  %v689_v63 = vcombine.high %v4550_v51, %v4550_v51  ;;  %v2967_v3 = vpack.c.bf16 %v471_v58, %v470_v45  ;;  %v480_v45 = vld [vmem:[%s4746_s1 + $0xe60] sm:$0xff]  ;;  %v481_v58 = vld [vmem:[%s4746_s1 + $0xe68] sm:$0xff]  ;;  %v3017_v60 = vpack.c.bf16 %v529_v54, %v528_v53  ;;  %v3046_v53 = vmov 0.0  }
  0xd6   :  { %2918 = vmatprep.subr.bf16.mxu0 %v2917_v1  ;;  %v521_v1 = vld [vmem:[%s4746_s1 + $0xfa8] sm:$0xff] }
  0xd7   :  { %2948 = vmatpush3.bf16.msra.mxu1 %v2947_v0  ;;  %v520_v0 = vld [vmem:[%s4746_s1 + $0xfa0] sm:$0xff] }
  0xd8   :  { %2950 = vmatprep.subr.bf16.mxu1 %v2949_v5  ;;  %v2969_v5 = vpack.c.bf16 %v489_v62, %v488_v61  ;;  %v3001_v9 = vpack.c.bf16 %v521_v1, %v520_v0  ;;  %v513_v61 = vld [vmem:[%s4746_s1 + $0xf68] sm:$0xff]  ;;  %v498_v62 = vld [vmem:[%s4746_s1 + $0xef0] sm:$0xff]  ;;  %v1934_v0 = vld [vmem:[%s4748_s2] ss:$0 sm:$0xff] }
  0xd9   :  { %2920 = vmatpush3.bf16.msra.mxu0 %v2919_v14  ;;  %v522_v14 = vld [vmem:[%s4746_s1 + $0xfb0] sm:$0xff] }
  0xda   :  { %2922 = vmatprep.subr.bf16.mxu0 %v2921_v16 }
  0xdb   :  { %2952 = vmatpush3.bf16.msra.mxu1 %v2951_v15  ;;  %v523_v15 = vld [vmem:[%s4746_s1 + $0xfb8] sm:$0xff] }
  0xdc   :  { %2954 = vmatprep.subr.bf16.mxu1 %v2953_v20  ;;  %v475_v20 = vld [vmem:[%s4746_s1 + $0xe38] sm:$0xff]  ;;  %v3005_v22 = vpack.c.bf16 %v523_v15, %v522_v14 }
  0xdd   :  { %2924 = vmatpush3.bf16.msra.mxu0 %v2923_v26  ;;  %v524_v26 = vld [vmem:[%s4746_s1 + $0xfc0] sm:$0xff] }
  0xde   :  { %2926 = vmatprep.subr.bf16.mxu0 %v2925_v29  ;;  %v3007_v29 = vpack.c.bf16 %v507_v23, %v506_v21  ;;  %v3009_v34 = vpack.c.bf16 %v525_v27, %v524_v26 }
  0xdf   :  { %2956 = vmatpush3.bf16.msra.mxu1 %v2955_v28  ;;  %v2975_v28 = vpack.c.bf16 %v475_v20, %v474_v19  ;;  %v2991_v19 = vpack.c.bf16 %v483_v12, %v482_v11 }
  0xe0   :  { %2958 = vmatprep.subr.bf16.mxu1 %v2957_v42  ;;  %v508_v42 = vld [vmem:[%s4746_s1 + $0xf40] sm:$0xff] }
  0xe1   :  { %2928 = vmatpush3.bf16.msra.mxu0 %v2927_v39  ;;  %v2979_v39 = vpack.c.bf16 %v477_v32, %v476_v30 }
  0xe2   :  { %2962 = vmatprep.subr.bf16.mxu0 %v2961_v41  ;;  %v2981_v41 = vpack.c.bf16 %v495_v52, %v494_v36 }
  0xe3   :  { %2960 = vmatpush3.bf16.msra.mxu1 %v2959_v40  ;;  %v3011_v40 = vpack.c.bf16 %v509_v35, %v508_v42 }
  0xe4   :  { %2994 = vmatprep.subr.bf16.mxu1 %v2993_v47  ;;  %1628 = vmatmul.mubr.f32.vlgmr.msra.gmra.mrb[12].mxu0 %v4343_v8  ;;  %v472_v8 = vld [vmem:[%s4746_s1 + $0xe20] sm:$0xff]  ;;  %v3013_v47 = vpack.c.bf16 %v527_v38, %v526_v37 }
  0xe5   :  { %2964 = vmatpush3.bf16.msra.mxu0 %v2963_v55  ;;  %1767 = vmatprep.mubr.f32.mxu0 %v689_v63  ;;  %v2971_v16 = vpack.c.bf16 %v473_v6, %v472_v8  ;;  %v2983_v55 = vpack.c.bf16 %v479_v44, %v478_v43  ;;  %v499_v63 = vld [vmem:[%s4746_s1 + $0xef8] sm:$0xff]  ;;  %v2987_v6 = vpack.c.bf16 %v481_v58, %v480_v45  ;;  %v3044_v43 = vmov 0.0|0.0  }
  0xe6   :  { %1698 = vmatmul.mubr.f32.vlgmr.msra.gmra.mrb[12].mxu1 %v4352_v10  ;;  %2966 = vmatprep.subr.bf16.mxu0 %v2965_v57  ;;  %v505_v10 = vld [vmem:[%s4746_s1 + $0xf28] sm:$0xff]  ;;  %v2985_v57 = vpack.c.bf16 %v497_v50, %v496_v49 }
  0xe7   :  { %2996 = vmatpush3.bf16.msra.mxu1 %v2995_v56  ;;  %1837 = vmatprep.mubr.f32.mxu1 %v690_v2  ;;  %v3003_v17 = vpack.c.bf16 %v505_v10, %v504_v7  ;;  %v3015_v56 = vpack.c.bf16 %v511_v48, %v510_v46  ;;  %v2989_v10 = vpack.c.bf16 %v499_v63, %v498_v62  ;;  %v1847_v48 = vld [vmem:[%s4749_s3 + $0x18] sm:$0xff] }
  0xe8   :  { %2998 = vmatprep.subr.bf16.mxu1 %v2997_v13 }
  0xe9   :  { %2968 = vmatpush3.bf16.msra.mxu0 %v2967_v3  ;;  %v530_v3 = vld [vmem:[%s4746_s1 + $0xff0] sm:$0xff] }
  0xea   :  { %2970 = vmatprep.subr.bf16.mxu0 %v2969_v5 }
  0xeb   :  { %3000 = vmatpush3.bf16.msra.mxu1 %v2999_v4  ;;  %v531_v4 = vld [vmem:[%s4746_s1 + $0xff8] sm:$0xff] }
  0xec   :  { %3002 = vmatprep.subr.bf16.mxu1 %v3001_v9  ;;  %v3019_v9 = vpack.c.bf16 %v513_v61, %v512_v59  ;;  %v3021_v15 = vpack.c.bf16 %v531_v4, %v530_v3 }
  0xed   :  { %2972 = vmatpush3.bf16.msra.mxu0 %v2971_v16  ;;  %v514_v16 = vld [vmem:[%s4746_s1 + $0xf70] sm:$0xff] }
  0xee   :  { %2974 = vmatprep.subr.bf16.mxu0 %v2973_v18 }
  0xef   :  { %3004 = vmatpush3.bf16.msra.mxu1 %v3003_v17  ;;  %v515_v17 = vld [vmem:[%s4746_s1 + $0xf78] sm:$0xff] }
  0xf0   :  { %3006 = vmatprep.subr.bf16.mxu1 %v3005_v22  ;;  %v3023_v20 = vpack.c.bf16 %v515_v17, %v514_v16 }
  0xf1   :  { %2976 = vmatpush3.bf16.msra.mxu0 %v2975_v28 }
  0xf2   :  { %2978 = vmatprep.subr.bf16.mxu0 %v2977_v31 }
  0xf3   :  { %3008 = vmatpush3.bf16.msra.mxu1 %v3007_v29 }
  0xf4   :  { %3010 = vmatprep.subr.bf16.mxu1 %v3009_v34 }
  0xf5   :  { %2980 = vmatpush3.bf16.msra.mxu0 %v2979_v39 }
  0xf6   :  { %2982 = vmatprep.subr.bf16.mxu0 %v2981_v41 }
  0xf7   :  { %3012 = vmatpush3.bf16.msra.mxu1 %v3011_v40  ;;  %v1969_v13 = vpop.f32.mrb[0].mxu0 }
  0xf8   :  { %3014 = vmatprep.subr.bf16.mxu1 %v3013_v47  ;;  %v1970_v1 = vpop.f32.mrb[1].mxu0  ;;  %v1846_v47 = vld [vmem:[%s4749_s3 + $0x10] sm:$0xff] }
  0xf9   :  { %v2004_v2 = vpop.f32.mrb[0].mxu1  ;;  %v1971_v5 = vadd.f32 %v1970_v1, %v1969_v13  ;;  %2984 = vmatpush3.bf16.msra.mxu0 %v2983_v55  ;;  %v3029_v49 = vpack.c.bf16 %v1847_v48, %v1846_v47 }
  0xfa   :  { %v2005_v8 = vpop.f32.mrb[1].mxu1  ;;  %2986 = vmatprep.subr.bf16.mxu0 %v2985_v57 }
  0xfb   :  { %v2006_v7 = vadd.f32 %v2005_v8, %v2004_v2  ;;  %3016 = vmatpush3.bf16.msra.mxu1 %v3015_v56  ;;  %v790_v14 = vadd.f32 %v1971_v5, %v1934_v0 }
  0xfc   :  { %3018 = vmatprep.subr.bf16.mxu1 %v3017_v60 }
  0xfd   :  { %v860_v18 = vadd.f32 %v2006_v7, %v790_v14  ;;  %2988 = vmatpush3.bf16.msra.mxu0 %v2987_v6 }
  0xfe   :  { %2990 = vmatprep.subr.bf16.mxu0 %v2989_v10 }
  0xff   :  { %3020 = vmatpush3.bf16.msra.mxu1 %v3019_v9 }
 0x100   :  { %3022 = vmatprep.subr.bf16.mxu1 %v3021_v15 }
 0x101   :  { %2992 = vmatpush3.bf16.msra.mxu0 %v2991_v19 }
 0x102   :  { %3025 = vmatprep.subr.bf16.mxu0 %v3044_v43 }
 0x103   :  { %3024 = vmatpush3.bf16.msra.mxu1 %v3023_v20 }
 0x104   :  { %1768 = vmatmul.mubr.f32.vlgmr.msra.gmra.mrb[14].mxu0 %v4550_v51  ;;  %v1844_v51 = vld [vmem:[%s4749_s3] sm:$0xff] }
 0x105   :  { %2510 = vmatprep.mubr.msk.f32.mxu0 %vm3045_vm0, %v3046_v53 }
 0x106   :  { %1838 = vmatmul.mubr.f32.vlgmr.msra.gmra.mrb[14].mxu1 %v4559_v33  ;;  %v1845_v33 = vld [vmem:[%s4749_s3 + $0x8] sm:$0xff] }
 0x107   :  { %v3026_v39 = vpack.c.bf16 %v1845_v33, %v1844_v51 }
 0x109   :  { %3027 = vmatpush3.bf16.msra.mxu0 %v3026_v39 }
 0x10a   :  { %3028 = vmatprep.subr.bf16.mxu0 %v3044_v43 }
 0x10d   :  { %3030 = vmatpush3.bf16.msra.mxu0 %v3029_v49 }
 0x117   :  { %v2039_v21 = vpop.f32.mrb[2].mxu0 }
 0x118   :  { %v2040_v22 = vpop.f32.mrb[3].mxu0 }
 0x119   :  { %v2074_v23 = vpop.f32.mrb[2].mxu1  ;;  %v2041_v24 = vadd.f32 %v2040_v22, %v2039_v21  ;;  %v1935_v22 = vld [vmem:[%s4750_s4] ss:$0 sm:$0xff] }
 0x11a   :  { %v2075_v25 = vpop.f32.mrb[3].mxu1 }
 0x11b   :  { %v2076_v26 = vadd.f32 %v2075_v25, %v2074_v23  ;;  %v930_v27 = vadd.f32 %v2041_v24, %v860_v18 }
 0x11d   :  { %v1000_v28 = vadd.f32 %v2076_v26, %v930_v27 }
 0x137   :  { %v2109_v29 = vpop.f32.mrb[4].mxu0 }
 0x138   :  { %v2110_v31 = vpop.f32.mrb[5].mxu0 }
 0x139   :  { %v2144_v30 = vpop.f32.mrb[4].mxu1  ;;  %v2111_v32 = vadd.f32 %v2110_v31, %v2109_v29 }
 0x13a   :  { %v2145_v42 = vpop.f32.mrb[5].mxu1 }
 0x13b   :  { %v2146_v34 = vadd.f32 %v2145_v42, %v2144_v30  ;;  %v1070_v35 = vadd.f32 %v2111_v32, %v1000_v28 }
 0x13d   :  { %v1140_v36 = vadd.f32 %v2146_v34, %v1070_v35 }
 0x157   :  { %v2179_v52 = vpop.f32.mrb[6].mxu0 }
 0x158   :  { %v2180_v37 = vpop.f32.mrb[7].mxu0 }
 0x159   :  { %v2214_v38 = vpop.f32.mrb[6].mxu1  ;;  %v2181_v40 = vadd.f32 %v2180_v37, %v2179_v52 }
 0x15a   :  { %v2215_v41 = vpop.f32.mrb[7].mxu1 }
 0x15b   :  { %v2216_v44 = vadd.f32 %v2215_v41, %v2214_v38  ;;  %v1210_v46 = vadd.f32 %v2181_v40, %v1140_v36 }
 0x15d   :  { %v1280_v50 = vadd.f32 %v2216_v44, %v1210_v46 }
 0x177   :  { %v2249_v54 = vpop.f32.mrb[8].mxu0 }
 0x178   :  { %v2250_v55 = vpop.f32.mrb[9].mxu0 }
 0x179   :  { %v2284_v56 = vpop.f32.mrb[8].mxu1  ;;  %v2251_v57 = vadd.f32 %v2250_v55, %v2249_v54 }
 0x17a   :  { %v2285_v45 = vpop.f32.mrb[9].mxu1 }
 0x17b   :  { %v2286_v58 = vadd.f32 %v2285_v45, %v2284_v56  ;;  %v1350_v59 = vadd.f32 %v2251_v57, %v1280_v50 }
 0x17d   :  { %v1420_v13 = vadd.f32 %v2286_v58, %v1350_v59 }
 0x197   :  { %v2319_v60 = vpop.f32.mrb[10].mxu0 }
 0x198   :  { %v2320_v61 = vpop.f32.mrb[11].mxu0 }
 0x199   :  { %v2354_v62 = vpop.f32.mrb[10].mxu1  ;;  %v2321_v63 = vadd.f32 %v2320_v61, %v2319_v60 }
 0x19a   :  { %v2355_v0 = vpop.f32.mrb[11].mxu1 }
 0x19b   :  { %v2356_v1 = vadd.f32 %v2355_v0, %v2354_v62  ;;  %v1490_v2 = vadd.f32 %v2321_v63, %v1420_v13 }
 0x19d   :  { %v1560_v3 = vadd.f32 %v2356_v1, %v1490_v2 }
 0x1b7   :  { %v2389_v4 = vpop.f32.mrb[12].mxu0 }
 0x1b8   :  { %v2390_v5 = vpop.f32.mrb[13].mxu0 }
 0x1b9   :  { %v2424_v8 = vpop.f32.mrb[12].mxu1  ;;  %v2391_v6 = vadd.f32 %v2390_v5, %v2389_v4 }
 0x1ba   :  { %v2425_v7 = vpop.f32.mrb[13].mxu1 }
 0x1bb   :  { %v2426_v9 = vadd.f32 %v2425_v7, %v2424_v8  ;;  %v1630_v10 = vadd.f32 %v2391_v6, %v1560_v3 }
 0x1bd   :  { %v1700_v11 = vadd.f32 %v2426_v9, %v1630_v10 }
 0x1d7   :  { %v2459_v12 = vpop.f32.mrb[14].mxu0 }
 0x1d8   :  { %v2460_v14 = vpop.f32.mrb[15].mxu0 }
 0x1d9   :  { %v2494_v15 = vpop.f32.mrb[14].mxu1  ;;  %v2461_v16 = vadd.f32 %v2460_v14, %v2459_v12 }
 0x1da   :  { %v2495_v17 = vpop.f32.mrb[15].mxu1 }
 0x1db   :  { %v2496_v18 = vadd.f32 %v2495_v17, %v2494_v15  ;;  %v1770_v19 = vadd.f32 %v2461_v16, %v1700_v11 }
 0x1dd   :  { %v1840_v20 = vadd.f32 %v2496_v18, %v1770_v19 }
 0x1df   :  { %v1843_v21 = vmax.f32 %v1840_v20, 0.0 }
 0x1e1   :  { %2511 = vmatmul.mubr.msk.f32.vlgmr.msra.gmra.mrb[16].mxu0 %vm1855_vm1, %v1843_v21 }
 0x2b4   :  { %v1925_v23 = vpop.f32.mrb[16].mxu0 }
 0x2b5   :  { %v1926_v24 = vadd.f32 %v1935_v22, %v1925_v23  ;;  %v2512_v25 = vpop.f32.mrb[17].mxu0 }
 0x2b7   :  { %1929 = vst [vmem:[%s4751_s5] sm:$0x3] %v1926_v24 }

</bundles_post_ra>
